<compile_context>
chip_gen: v5e
topology: v5e:2x2
jax: 0.10.0
libtpu: 0.0.40
codegen_flags: <defaults>
</compile_context>

<pallas_src>
import functools

import jax
import jax.numpy as jnp
import numpy as np
from jax.experimental import pallas as pl
from jax.experimental.pallas import tpu as pltpu


# ----------------------------------------------------------------------------
# Fused Bottleneck kernel: one grid step per image.
# ----------------------------------------------------------------------------
def bottleneck_kernel(x_ref,
                      w1_ref, b1_ref,
                      w2_ref, b2_ref,
                      w3_ref, b3_ref,
                      fc1_ref, fc2_ref,
                      o_ref,
                      h1pad_ref,
                      *, H, W, planes):
    HW = H * W
    PAD = 2 * W  # zero-halo rows above / below the interior (>= W + 1)

    x = x_ref[0]                                               # (HW, Cin)

    # ---- conv1 (1x1) + bn1 + relu  (bn1 scale pre-folded into w1) --------
    h1 = jnp.dot(x, w1_ref[...], preferred_element_type=jnp.float32)
    h1 = jnp.maximum(h1 + b1_ref[...], 0.0)                    # (HW, P)

    # ---- conv2 (3x3, pad=1, stride=1) as 9 shifted matmuls from VMEM -----
    # Vertical out-of-bounds taps read the zero halo rows; horizontal wrap
    # is removed with a per-column mask.  Only halo rows are re-zeroed each
    # step (megacore-safe; the interior is always fully overwritten).
    h1pad_ref[pl.ds(0, PAD), :] = jnp.zeros((PAD, planes), jnp.float32)
    h1pad_ref[pl.ds(PAD + HW, 2 * W), :] = jnp.zeros((2 * W, planes),
                                                     jnp.float32)
    h1pad_ref[pl.ds(PAD, HW), :] = h1

    # Column index of each output pixel, used to mask horizontal wrap-around.
    col = jax.lax.broadcasted_iota(jnp.int32, (HW, planes), 0) % W
    keep_left = col >= 1                                       # valid for dx == 0
    keep_right = col <= (W - 2)                                # valid for dx == 2

    acc = jnp.zeros((HW, planes), jnp.float32)
    for dy in range(3):
        for dx in range(3):
            shift = (dy - 1) * W + (dx - 1)
            tap = h1pad_ref[pl.ds(PAD + shift, HW), :]         # (HW, P)
            if dx == 0:
                tap = jnp.where(keep_left, tap, 0.0)
            elif dx == 2:
                tap = jnp.where(keep_right, tap, 0.0)
            acc = acc + jnp.dot(tap, w2_ref[dy * 3 + dx],
                                preferred_element_type=jnp.float32)
    h2 = jnp.maximum(acc + b2_ref[...], 0.0)                   # (HW, P)

    # ---- conv3 (1x1) + bn3 (no relu yet; bn3 scale pre-folded) ------------
    h3 = jnp.dot(h2, w3_ref[...], preferred_element_type=jnp.float32)
    h3 = h3 + b3_ref[...]                                      # (HW, C4)

    # ---- SE: global average pool -> fc1 -> relu -> fc2 -> sigmoid --------
    y = jnp.mean(h3, axis=0, keepdims=True)                    # (1, C4)
    hfc = jnp.maximum(
        jnp.dot(y, fc1_ref[...], preferred_element_type=jnp.float32), 0.0)
    s = jax.nn.sigmoid(
        jnp.dot(hfc, fc2_ref[...], preferred_element_type=jnp.float32))  # (1, C4)

    # ---- scale + residual add + final relu --------------------------------
    # downsample is None and Cin == C4 (inplanes == planes*expansion),
    # so the residual is simply the block input.
    o_ref[0] = jnp.maximum(h3 * s + x, 0.0).astype(o_ref.dtype)
    # TODO(synk): for larger channel counts, present a 128-lane-dense output
    # slab to avoid masked partial stores on the 64-wide channel dim.


# ----------------------------------------------------------------------------
# Wrapper: NCHW in / NCHW out (matching PyTorch), single fused pallas_call.
# ----------------------------------------------------------------------------
def bottleneck_forward(x_nchw, p):
    b, cin, h, w = x_nchw.shape
    hw = h * w
    planes = p["w1"].shape[1]
    c4 = p["w3"].shape[1]
    cr = p["fc1"].shape[1]

    x_nhwc = jnp.transpose(x_nchw, (0, 2, 3, 1)).reshape(b, hw, cin)

    flops = int(b * (2 * hw * cin * planes
                     + 9 * 2 * hw * planes * planes
                     + 2 * hw * planes * c4
                     + 2 * c4 * cr + 2 * cr * c4))
    bytes_accessed = int(4 * (b * hw * cin + b * hw * c4
                              + cin * planes + 9 * planes * planes
                              + planes * c4 + c4 * cr + cr * c4
                              + 2 * planes + c4))

    kernel = functools.partial(bottleneck_kernel, H=h, W=w, planes=planes)

    out = pl.pallas_call(
        kernel,
        out_shape=jax.ShapeDtypeStruct((b, hw, c4), jnp.float32),
        grid=(b,),
        in_specs=[
            pl.BlockSpec((1, hw, cin), lambda i: (i, 0, 0)),         # x (per image)
            pl.BlockSpec((cin, planes), lambda i: (0, 0)),           # w1 (bn1 folded)
            pl.BlockSpec((1, planes), lambda i: (0, 0)),             # b1
            pl.BlockSpec((9, planes, planes), lambda i: (0, 0, 0)),  # w2 taps (bn2 folded)
            pl.BlockSpec((1, planes), lambda i: (0, 0)),             # b2
            pl.BlockSpec((planes, c4), lambda i: (0, 0)),            # w3 (bn3 folded)
            pl.BlockSpec((1, c4), lambda i: (0, 0)),                 # b3
            pl.BlockSpec((c4, cr), lambda i: (0, 0)),                # fc1
            pl.BlockSpec((cr, c4), lambda i: (0, 0)),                # fc2
        ],
        out_specs=pl.BlockSpec((1, hw, c4), lambda i: (i, 0, 0)),
        scratch_shapes=[pltpu.VMEM((hw + 4 * w, planes), jnp.float32)],
        compiler_params=pltpu.CompilerParams(
            dimension_semantics=("parallel",),
            vmem_limit_bytes=32 * 1024 * 1024),
        cost_estimate=pl.CostEstimate(
            flops=flops, transcendentals=int(b * c4),
            bytes_accessed=bytes_accessed),
    )(x_nhwc, p["w1"], p["b1"], p["w2"], p["b2"],
      p["w3"], p["b3"], p["fc1"], p["fc2"])

    return jnp.transpose(out.reshape(b, h, w, c4), (0, 3, 1, 2))


# ----------------------------------------------------------------------------
# BN folding helper (inference-mode BatchNorm -> per-channel scale/bias)
# ----------------------------------------------------------------------------
def fold_bn(gamma, beta, rmean, rvar, eps=1e-5):
    scale = gamma / jnp.sqrt(rvar + eps)
    bias = beta - rmean * scale
    return scale.reshape(1, -1), bias.reshape(1, -1)


# ----------------------------------------------------------------------------
# Pure-JAX reference (mirrors the PyTorch forward, eval-mode BN)
# ----------------------------------------------------------------------------
def reference_forward(x, raw, eps=1e-5):
    def conv(x, w, stride, pad):
        return jax.lax.conv_general_dilated(
            x, w, (stride, stride), [(pad, pad), (pad, pad)],
            dimension_numbers=("NCHW", "OIHW", "NCHW"),
            precision=jax.lax.Precision.HIGHEST)

    def bn(x, g, bta, rm, rv):
        return ((x - rm[None, :, None, None]) / jnp.sqrt(rv[None, :, None, None] + eps)
                * g[None, :, None, None] + bta[None, :, None, None])

    out = jax.nn.relu(bn(conv(x, raw["conv1_w"], 1, 0), *raw["bn1"]))
    out = jax.nn.relu(bn(conv(out, raw["conv2_w"], 1, 1), *raw["bn2"]))
    out = bn(conv(out, raw["conv3_w"], 1, 0), *raw["bn3"])
    y = jnp.mean(out, axis=(2, 3))                       # (B, C)
    y = jax.nn.relu(y @ raw["fc1_w"].T)
    y = jax.nn.sigmoid(y @ raw["fc2_w"].T)
    out = out * y[:, :, None, None]
    return jax.nn.relu(out + x)


# ----------------------------------------------------------------------------
# Deterministic parameter construction (kernel params have BN scale folded in)
# ----------------------------------------------------------------------------
def make_params(key, inplanes, planes, reduction=16, expansion=4):
    c4 = planes * expansion
    cr = c4 // reduction
    ks = jax.random.split(key, 16)

    def bn_params(k, c):
        k1, k2, k3, k4 = jax.random.split(k, 4)
        gamma = 1.0 + 0.1 * jax.random.normal(k1, (c,), jnp.float32)
        beta = 0.1 * jax.random.normal(k2, (c,), jnp.float32)
        rmean = 0.1 * jax.random.normal(k3, (c,), jnp.float32)
        rvar = 1.0 + 0.1 * jnp.abs(jax.random.normal(k4, (c,), jnp.float32))
        return gamma, beta, rmean, rvar

    raw = {
        "conv1_w": 0.1 * jax.random.normal(ks[0], (planes, inplanes, 1, 1), jnp.float32),
        "conv2_w": 0.1 * jax.random.normal(ks[1], (planes, planes, 3, 3), jnp.float32),
        "conv3_w": 0.1 * jax.random.normal(ks[2], (c4, planes, 1, 1), jnp.float32),
        "bn1": bn_params(ks[3], planes),
        "bn2": bn_params(ks[4], planes),
        "bn3": bn_params(ks[5], c4),
        "fc1_w": 0.1 * jax.random.normal(ks[6], (cr, c4), jnp.float32),  # Linear(c4 -> cr)
        "fc2_w": 0.1 * jax.random.normal(ks[7], (c4, cr), jnp.float32),  # Linear(cr -> c4)
    }

    s1, b1 = fold_bn(*raw["bn1"])
    s2, b2 = fold_bn(*raw["bn2"])
    s3, b3 = fold_bn(*raw["bn3"])

    # 1x1 convs as (Cin, Cout) matrices; 3x3 conv as 9 per-tap (Cin, Cout)
    # matrices; BN scale folded directly into the output-channel dim.
    w1 = raw["conv1_w"][:, :, 0, 0].T * s1                               # (Cin, P)
    w2 = (jnp.transpose(raw["conv2_w"], (2, 3, 1, 0)).reshape(9, planes, planes)
          * s2.reshape(1, 1, planes))                                    # (9, P, P)
    w3 = raw["conv3_w"][:, :, 0, 0].T * s3                               # (P, C4)

    p = {
        "w1": w1, "b1": b1,
        "w2": w2, "b2": b2,
        "w3": w3, "b3": b3,
        "fc1": raw["fc1_w"].T,                                           # (C4, C4//r)
        "fc2": raw["fc2_w"].T,                                           # (C4//r, C4)
    }
    return p, raw


if __name__ == "__main__":
    planes, expansion, reduction = 16, 4, 16
    inplanes = planes * expansion          # downsample=None requires inplanes == planes*4
    B, H, W = 2, 8, 8

    key = jax.random.PRNGKey(0)
    kx, kp = jax.random.split(key)
    x = jax.random.normal(kx, (B, inplanes, H, W), jnp.float32)

    params, raw = make_params(kp, inplanes, planes, reduction, expansion)

    fwd = jax.jit(bottleneck_forward)
    out = jax.block_until_ready(fwd(x, params))

    ref = jax.block_until_ready(reference_forward(x, raw))
    assert out.shape == (B, inplanes, H, W)
    assert np.allclose(np.asarray(out), np.asarray(ref), rtol=1e-2, atol=1e-2), \
        "Pallas Bottleneck output mismatch vs JAX reference"

    print("KERNEL_OK")
</pallas_src>

<mosaic_0001>
module attributes {stable_mosaic.version = 11 : i64} {
  func.func @bottleneck_kernel(%arg0: i32, %arg1: memref<1x64x64xf32, #tpu.memory_space<vmem>>, %arg2: memref<64x16xf32, #tpu.memory_space<vmem>>, %arg3: memref<1x16xf32, #tpu.memory_space<vmem>>, %arg4: memref<9x16x16xf32, #tpu.memory_space<vmem>>, %arg5: memref<1x16xf32, #tpu.memory_space<vmem>>, %arg6: memref<16x64xf32, #tpu.memory_space<vmem>>, %arg7: memref<1x64xf32, #tpu.memory_space<vmem>>, %arg8: memref<64x4xf32, #tpu.memory_space<vmem>>, %arg9: memref<4x64xf32, #tpu.memory_space<vmem>>, %arg10: memref<1x64x64xf32, #tpu.memory_space<vmem>>, %arg11: memref<96x16xf32, #tpu.memory_space<vmem>>) attributes {dimension_semantics = [#tpu.dimension_semantics<parallel>], iteration_bounds = array<i64: 2>, scalar_prefetch = 0 : i64, scratch_operands = 1 : i64, tpu.core_type = #tpu.core_type<tc>, window_params = [{transform_indices = @transform_0, window_bounds = array<i64: 1, 64, 64>}, {pipeline_mode = #tpu.pipeline_mode<synchronous>, transform_indices = @transform_1, window_bounds = array<i64: 64, 16>}, {pipeline_mode = #tpu.pipeline_mode<synchronous>, transform_indices = @transform_2, window_bounds = array<i64: 1, 16>}, {pipeline_mode = #tpu.pipeline_mode<synchronous>, transform_indices = @transform_3, window_bounds = array<i64: 9, 16, 16>}, {pipeline_mode = #tpu.pipeline_mode<synchronous>, transform_indices = @transform_4, window_bounds = array<i64: 1, 16>}, {pipeline_mode = #tpu.pipeline_mode<synchronous>, transform_indices = @transform_5, window_bounds = array<i64: 16, 64>}, {pipeline_mode = #tpu.pipeline_mode<synchronous>, transform_indices = @transform_6, window_bounds = array<i64: 1, 64>}, {pipeline_mode = #tpu.pipeline_mode<synchronous>, transform_indices = @transform_7, window_bounds = array<i64: 64, 4>}, {pipeline_mode = #tpu.pipeline_mode<synchronous>, transform_indices = @transform_8, window_bounds = array<i64: 4, 64>}, {transform_indices = @transform_9, window_bounds = array<i64: 1, 64, 64>}]} {
    %c0 = arith.constant 0 : index
    %c0_0 = arith.constant 0 : index
    %c0_1 = arith.constant 0 : index
    %0 = vector.load %arg1[%c0, %c0_0, %c0_1] : memref<1x64x64xf32, #tpu.memory_space<vmem>>, vector<1x64x64xf32>
    %1 = vector.shape_cast %0 : vector<1x64x64xf32> to vector<64x64xf32>
    %c0_2 = arith.constant 0 : index
    %c0_3 = arith.constant 0 : index
    %2 = vector.load %arg2[%c0_2, %c0_3] : memref<64x16xf32, #tpu.memory_space<vmem>>, vector<64x16xf32>
    %cst = arith.constant dense<0.000000e+00> : vector<64x16xf32>
    %3 = tpu.matmul %1, %2, %cst {dimension_numbers = #tpu.dot_dimension_numbers<[1], [0], [0], [1], [0, 0, 1, 1], [], []>} : vector<64x64xf32>, vector<64x16xf32>, vector<64x16xf32> -> vector<64x16xf32>
    %c0_4 = arith.constant 0 : index
    %c0_5 = arith.constant 0 : index
    %4 = vector.load %arg3[%c0_4, %c0_5] : memref<1x16xf32, #tpu.memory_space<vmem>>, vector<1x16xf32>
    %5 = vector.broadcast %4 : vector<1x16xf32> to vector<64x16xf32>
    %6 = arith.addf %3, %5 : vector<64x16xf32>
    %cst_6 = arith.constant 0.000000e+00 : f32
    %7 = vector.broadcast %cst_6 : f32 to vector<64x16xf32>
    %8 = arith.maximumf %6, %7 : vector<64x16xf32>
    %cst_7 = arith.constant 0.000000e+00 : f32
    %9 = vector.broadcast %cst_7 : f32 to vector<16x16xf32>
    %c0_8 = arith.constant 0 : index
    %c0_9 = arith.constant 0 : index
    %10 = vector.load %arg11[%c0_8, %c0_9] : memref<96x16xf32, #tpu.memory_space<vmem>>, vector<16x16xf32>
    tpu.vector_store %arg11[%c0_8, %c0_9], %9 {strides = array<i32>} : memref<96x16xf32, #tpu.memory_space<vmem>>, vector<16x16xf32>,
    %cst_10 = arith.constant 0.000000e+00 : f32
    %11 = vector.broadcast %cst_10 : f32 to vector<16x16xf32>
    %c80 = arith.constant 80 : index
    %c0_11 = arith.constant 0 : index
    %12 = vector.load %arg11[%c80, %c0_11] : memref<96x16xf32, #tpu.memory_space<vmem>>, vector<16x16xf32>
    tpu.vector_store %arg11[%c80, %c0_11], %11 {strides = array<i32>} : memref<96x16xf32, #tpu.memory_space<vmem>>, vector<16x16xf32>,
    %c16 = arith.constant 16 : index
    %c0_12 = arith.constant 0 : index
    %13 = vector.load %arg11[%c16, %c0_12] : memref<96x16xf32, #tpu.memory_space<vmem>>, vector<64x16xf32>
    tpu.vector_store %arg11[%c16, %c0_12], %8 {strides = array<i32>} : memref<96x16xf32, #tpu.memory_space<vmem>>, vector<64x16xf32>,
    %14 = tpu.iota {dimensions = array<i32: 0>} : vector<64x16xi32>
    %c8_i32 = arith.constant 8 : i32
    %c0_i32 = arith.constant 0 : i32
    %15 = arith.cmpi eq, %c8_i32, %c0_i32 : i32
    %c1_i32 = arith.constant 1 : i32
    %16 = arith.select %15, %c1_i32, %c8_i32 : i32
    %17 = vector.broadcast %16 : i32 to vector<64x16xi32>
    %18 = arith.remsi %14, %17 : vector<64x16xi32>
    %c0_i32_13 = arith.constant 0 : i32
    %19 = vector.broadcast %c0_i32_13 : i32 to vector<64x16xi32>
    %20 = arith.cmpi ne, %18, %19 : vector<64x16xi32>
    %c0_i32_14 = arith.constant 0 : i32
    %21 = vector.broadcast %c0_i32_14 : i32 to vector<64x16xi32>
    %22 = arith.cmpi slt, %18, %21 : vector<64x16xi32>
    %c0_i32_15 = arith.constant 0 : i32
    %23 = arith.cmpi slt, %16, %c0_i32_15 : i32
    %24 = vector.broadcast %23 : i1 to vector<64x16xi1>
    %25 = vector.broadcast %24 : vector<64x16xi1> to vector<64x16xi1>
    %26 = arith.xori %22, %25 : vector<64x16xi1>
    %27 = arith.andi %26, %20 : vector<64x16xi1>
    %28 = vector.broadcast %16 : i32 to vector<64x16xi32>
    %29 = arith.addi %18, %28 : vector<64x16xi32>
    %30 = arith.select %27, %29, %18 : vector<64x16xi1>, vector<64x16xi32>
    %c1_i32_16 = arith.constant 1 : i32
    %31 = vector.broadcast %c1_i32_16 : i32 to vector<64x16xi32>
    %32 = arith.cmpi sge, %30, %31 : vector<64x16xi32>
    %c6_i32 = arith.constant 6 : i32
    %33 = vector.broadcast %c6_i32 : i32 to vector<64x16xi32>
    %34 = arith.cmpi sle, %30, %33 : vector<64x16xi32>
    %cst_17 = arith.constant 0.000000e+00 : f32
    %35 = vector.broadcast %cst_17 : f32 to vector<64x16xf32>
    %c7 = arith.constant 7 : index
    %c0_18 = arith.constant 0 : index
    %36 = vector.load %arg11[%c7, %c0_18] : memref<96x16xf32, #tpu.memory_space<vmem>>, vector<64x16xf32>
    %cst_19 = arith.constant 0.000000e+00 : f32
    %37 = vector.broadcast %cst_19 : f32 to vector<64x16xf32>
    %38 = arith.select %32, %36, %37 : vector<64x16xi1>, vector<64x16xf32>
    %c0_20 = arith.constant 0 : index
    %c0_21 = arith.constant 0 : index
    %c0_22 = arith.constant 0 : index
    %39 = vector.load %arg4[%c0_20, %c0_21, %c0_22] : memref<9x16x16xf32, #tpu.memory_space<vmem>>, vector<1x16x16xf32>
    %40 = vector.shape_cast %39 : vector<1x16x16xf32> to vector<16x16xf32>
    %cst_23 = arith.constant dense<0.000000e+00> : vector<64x16xf32>
    %41 = tpu.matmul %38, %40, %cst_23 {dimension_numbers = #tpu.dot_dimension_numbers<[1], [0], [0], [1], [0, 0, 1, 1], [], []>} : vector<64x16xf32>, vector<16x16xf32>, vector<64x16xf32> -> vector<64x16xf32>
    %42 = arith.addf %35, %41 : vector<64x16xf32>
    %c8 = arith.constant 8 : index
    %c0_24 = arith.constant 0 : index
    %43 = vector.load %arg11[%c8, %c0_24] : memref<96x16xf32, #tpu.memory_space<vmem>>, vector<64x16xf32>
    %c1 = arith.constant 1 : index
    %c0_25 = arith.constant 0 : index
    %c0_26 = arith.constant 0 : index
    %44 = vector.load %arg4[%c1, %c0_25, %c0_26] : memref<9x16x16xf32, #tpu.memory_space<vmem>>, vector<1x16x16xf32>
    %45 = vector.shape_cast %44 : vector<1x16x16xf32> to vector<16x16xf32>
    %cst_27 = arith.constant dense<0.000000e+00> : vector<64x16xf32>
    %46 = tpu.matmul %43, %45, %cst_27 {dimension_numbers = #tpu.dot_dimension_numbers<[1], [0], [0], [1], [0, 0, 1, 1], [], []>} : vector<64x16xf32>, vector<16x16xf32>, vector<64x16xf32> -> vector<64x16xf32>
    %47 = arith.addf %42, %46 : vector<64x16xf32>
    %c9 = arith.constant 9 : index
    %c0_28 = arith.constant 0 : index
    %48 = vector.load %arg11[%c9, %c0_28] : memref<96x16xf32, #tpu.memory_space<vmem>>, vector<64x16xf32>
    %cst_29 = arith.constant 0.000000e+00 : f32
    %49 = vector.broadcast %cst_29 : f32 to vector<64x16xf32>
    %50 = arith.select %34, %48, %49 : vector<64x16xi1>, vector<64x16xf32>
    %c2 = arith.constant 2 : index
    %c0_30 = arith.constant 0 : index
    %c0_31 = arith.constant 0 : index
    %51 = vector.load %arg4[%c2, %c0_30, %c0_31] : memref<9x16x16xf32, #tpu.memory_space<vmem>>, vector<1x16x16xf32>
    %52 = vector.shape_cast %51 : vector<1x16x16xf32> to vector<16x16xf32>
    %cst_32 = arith.constant dense<0.000000e+00> : vector<64x16xf32>
    %53 = tpu.matmul %50, %52, %cst_32 {dimension_numbers = #tpu.dot_dimension_numbers<[1], [0], [0], [1], [0, 0, 1, 1], [], []>} : vector<64x16xf32>, vector<16x16xf32>, vector<64x16xf32> -> vector<64x16xf32>
    %54 = arith.addf %47, %53 : vector<64x16xf32>
    %c15 = arith.constant 15 : index
    %c0_33 = arith.constant 0 : index
    %55 = vector.load %arg11[%c15, %c0_33] : memref<96x16xf32, #tpu.memory_space<vmem>>, vector<64x16xf32>
    %cst_34 = arith.constant 0.000000e+00 : f32
    %56 = vector.broadcast %cst_34 : f32 to vector<64x16xf32>
    %57 = arith.select %32, %55, %56 : vector<64x16xi1>, vector<64x16xf32>
    %c3 = arith.constant 3 : index
    %c0_35 = arith.constant 0 : index
    %c0_36 = arith.constant 0 : index
    %58 = vector.load %arg4[%c3, %c0_35, %c0_36] : memref<9x16x16xf32, #tpu.memory_space<vmem>>, vector<1x16x16xf32>
    %59 = vector.shape_cast %58 : vector<1x16x16xf32> to vector<16x16xf32>
    %cst_37 = arith.constant dense<0.000000e+00> : vector<64x16xf32>
    %60 = tpu.matmul %57, %59, %cst_37 {dimension_numbers = #tpu.dot_dimension_numbers<[1], [0], [0], [1], [0, 0, 1, 1], [], []>} : vector<64x16xf32>, vector<16x16xf32>, vector<64x16xf32> -> vector<64x16xf32>
    %61 = arith.addf %54, %60 : vector<64x16xf32>
    %c16_38 = arith.constant 16 : index
    %c0_39 = arith.constant 0 : index
    %62 = vector.load %arg11[%c16_38, %c0_39] : memref<96x16xf32, #tpu.memory_space<vmem>>, vector<64x16xf32>
    %c4 = arith.constant 4 : index
    %c0_40 = arith.constant 0 : index
    %c0_41 = arith.constant 0 : index
    %63 = vector.load %arg4[%c4, %c0_40, %c0_41] : memref<9x16x16xf32, #tpu.memory_space<vmem>>, vector<1x16x16xf32>
    %64 = vector.shape_cast %63 : vector<1x16x16xf32> to vector<16x16xf32>
    %cst_42 = arith.constant dense<0.000000e+00> : vector<64x16xf32>
    %65 = tpu.matmul %62, %64, %cst_42 {dimension_numbers = #tpu.dot_dimension_numbers<[1], [0], [0], [1], [0, 0, 1, 1], [], []>} : vector<64x16xf32>, vector<16x16xf32>, vector<64x16xf32> -> vector<64x16xf32>
    %66 = arith.addf %61, %65 : vector<64x16xf32>
    %c17 = arith.constant 17 : index
    %c0_43 = arith.constant 0 : index
    %67 = vector.load %arg11[%c17, %c0_43] : memref<96x16xf32, #tpu.memory_space<vmem>>, vector<64x16xf32>
    %cst_44 = arith.constant 0.000000e+00 : f32
    %68 = vector.broadcast %cst_44 : f32 to vector<64x16xf32>
    %69 = arith.select %34, %67, %68 : vector<64x16xi1>, vector<64x16xf32>
    %c5 = arith.constant 5 : index
    %c0_45 = arith.constant 0 : index
    %c0_46 = arith.constant 0 : index
    %70 = vector.load %arg4[%c5, %c0_45, %c0_46] : memref<9x16x16xf32, #tpu.memory_space<vmem>>, vector<1x16x16xf32>
    %71 = vector.shape_cast %70 : vector<1x16x16xf32> to vector<16x16xf32>
    %cst_47 = arith.constant dense<0.000000e+00> : vector<64x16xf32>
    %72 = tpu.matmul %69, %71, %cst_47 {dimension_numbers = #tpu.dot_dimension_numbers<[1], [0], [0], [1], [0, 0, 1, 1], [], []>} : vector<64x16xf32>, vector<16x16xf32>, vector<64x16xf32> -> vector<64x16xf32>
    %73 = arith.addf %66, %72 : vector<64x16xf32>
    %c23 = arith.constant 23 : index
    %c0_48 = arith.constant 0 : index
    %74 = vector.load %arg11[%c23, %c0_48] : memref<96x16xf32, #tpu.memory_space<vmem>>, vector<64x16xf32>
    %cst_49 = arith.constant 0.000000e+00 : f32
    %75 = vector.broadcast %cst_49 : f32 to vector<64x16xf32>
    %76 = arith.select %32, %74, %75 : vector<64x16xi1>, vector<64x16xf32>
    %c6 = arith.constant 6 : index
    %c0_50 = arith.constant 0 : index
    %c0_51 = arith.constant 0 : index
    %77 = vector.load %arg4[%c6, %c0_50, %c0_51] : memref<9x16x16xf32, #tpu.memory_space<vmem>>, vector<1x16x16xf32>
    %78 = vector.shape_cast %77 : vector<1x16x16xf32> to vector<16x16xf32>
    %cst_52 = arith.constant dense<0.000000e+00> : vector<64x16xf32>
    %79 = tpu.matmul %76, %78, %cst_52 {dimension_numbers = #tpu.dot_dimension_numbers<[1], [0], [0], [1], [0, 0, 1, 1], [], []>} : vector<64x16xf32>, vector<16x16xf32>, vector<64x16xf32> -> vector<64x16xf32>
    %80 = arith.addf %73, %79 : vector<64x16xf32>
    %c24 = arith.constant 24 : index
    %c0_53 = arith.constant 0 : index
    %81 = vector.load %arg11[%c24, %c0_53] : memref<96x16xf32, #tpu.memory_space<vmem>>, vector<64x16xf32>
    %c7_54 = arith.constant 7 : index
    %c0_55 = arith.constant 0 : index
    %c0_56 = arith.constant 0 : index
    %82 = vector.load %arg4[%c7_54, %c0_55, %c0_56] : memref<9x16x16xf32, #tpu.memory_space<vmem>>, vector<1x16x16xf32>
    %83 = vector.shape_cast %82 : vector<1x16x16xf32> to vector<16x16xf32>
    %cst_57 = arith.constant dense<0.000000e+00> : vector<64x16xf32>
    %84 = tpu.matmul %81, %83, %cst_57 {dimension_numbers = #tpu.dot_dimension_numbers<[1], [0], [0], [1], [0, 0, 1, 1], [], []>} : vector<64x16xf32>, vector<16x16xf32>, vector<64x16xf32> -> vector<64x16xf32>
    %85 = arith.addf %80, %84 : vector<64x16xf32>
    %c25 = arith.constant 25 : index
    %c0_58 = arith.constant 0 : index
    %86 = vector.load %arg11[%c25, %c0_58] : memref<96x16xf32, #tpu.memory_space<vmem>>, vector<64x16xf32>
    %cst_59 = arith.constant 0.000000e+00 : f32
    %87 = vector.broadcast %cst_59 : f32 to vector<64x16xf32>
    %88 = arith.select %34, %86, %87 : vector<64x16xi1>, vector<64x16xf32>
    %c8_60 = arith.constant 8 : index
    %c0_61 = arith.constant 0 : index
    %c0_62 = arith.constant 0 : index
    %89 = vector.load %arg4[%c8_60, %c0_61, %c0_62] : memref<9x16x16xf32, #tpu.memory_space<vmem>>, vector<1x16x16xf32>
    %90 = vector.shape_cast %89 : vector<1x16x16xf32> to vector<16x16xf32>
    %cst_63 = arith.constant dense<0.000000e+00> : vector<64x16xf32>
    %91 = tpu.matmul %88, %90, %cst_63 {dimension_numbers = #tpu.dot_dimension_numbers<[1], [0], [0], [1], [0, 0, 1, 1], [], []>} : vector<64x16xf32>, vector<16x16xf32>, vector<64x16xf32> -> vector<64x16xf32>
    %92 = arith.addf %85, %91 : vector<64x16xf32>
    %c0_64 = arith.constant 0 : index
    %c0_65 = arith.constant 0 : index
    %93 = vector.load %arg5[%c0_64, %c0_65] : memref<1x16xf32, #tpu.memory_space<vmem>>, vector<1x16xf32>
    %94 = vector.broadcast %93 : vector<1x16xf32> to vector<64x16xf32>
    %95 = arith.addf %92, %94 : vector<64x16xf32>
    %cst_66 = arith.constant 0.000000e+00 : f32
    %96 = vector.broadcast %cst_66 : f32 to vector<64x16xf32>
    %97 = arith.maximumf %95, %96 : vector<64x16xf32>
    %c0_67 = arith.constant 0 : index
    %c0_68 = arith.constant 0 : index
    %98 = vector.load %arg6[%c0_67, %c0_68] : memref<16x64xf32, #tpu.memory_space<vmem>>, vector<16x64xf32>
    %cst_69 = arith.constant dense<0.000000e+00> : vector<64x64xf32>
    %99 = tpu.matmul %97, %98, %cst_69 {dimension_numbers = #tpu.dot_dimension_numbers<[1], [0], [0], [1], [0, 0, 1, 1], [], []>} : vector<64x16xf32>, vector<16x64xf32>, vector<64x64xf32> -> vector<64x64xf32>
    %c0_70 = arith.constant 0 : index
    %c0_71 = arith.constant 0 : index
    %100 = vector.load %arg7[%c0_70, %c0_71] : memref<1x64xf32, #tpu.memory_space<vmem>>, vector<1x64xf32>
    %101 = vector.broadcast %100 : vector<1x64xf32> to vector<64x64xf32>
    %102 = arith.addf %99, %101 : vector<64x64xf32>
    %cst_72 = arith.constant dense<0.000000e+00> : vector<64xf32>
    %103 = vector.multi_reduction <add>, %102, %cst_72 [0] : vector<64x64xf32> to vector<64xf32>
    %104 = vector.shape_cast %103 : vector<64xf32> to vector<1x64xf32>
    %cst_73 = arith.constant 6.400000e+01 : f32
    %105 = vector.broadcast %cst_73 : f32 to vector<1x64xf32>
    %106 = arith.divf %104, %105 : vector<1x64xf32>
    %c0_74 = arith.constant 0 : index
    %c0_75 = arith.constant 0 : index
    %107 = vector.load %arg8[%c0_74, %c0_75] : memref<64x4xf32, #tpu.memory_space<vmem>>, vector<64x4xf32>
    %cst_76 = arith.constant dense<0.000000e+00> : vector<1x4xf32>
    %108 = tpu.matmul %106, %107, %cst_76 {dimension_numbers = #tpu.dot_dimension_numbers<[1], [0], [0], [1], [0, 0, 1, 1], [], []>} : vector<1x64xf32>, vector<64x4xf32>, vector<1x4xf32> -> vector<1x4xf32>
    %cst_77 = arith.constant 0.000000e+00 : f32
    %109 = vector.broadcast %cst_77 : f32 to vector<1x4xf32>
    %110 = arith.maximumf %108, %109 : vector<1x4xf32>
    %c0_78 = arith.constant 0 : index
    %c0_79 = arith.constant 0 : index
    %111 = vector.load %arg9[%c0_78, %c0_79] : memref<4x64xf32, #tpu.memory_space<vmem>>, vector<4x64xf32>
    %cst_80 = arith.constant dense<0.000000e+00> : vector<1x64xf32>
    %112 = tpu.matmul %110, %111, %cst_80 {dimension_numbers = #tpu.dot_dimension_numbers<[1], [0], [0], [1], [0, 0, 1, 1], [], []>} : vector<1x4xf32>, vector<4x64xf32>, vector<1x64xf32> -> vector<1x64xf32>
    %113 = arith.negf %112 : vector<1x64xf32>
    %114 = math.exp %113 : vector<1x64xf32>
    %cst_81 = arith.constant 1.000000e+00 : f32
    %115 = vector.broadcast %cst_81 : f32 to vector<1x64xf32>
    %116 = arith.addf %115, %114 : vector<1x64xf32>
    %117 = arith.divf %115, %116 : vector<1x64xf32>
    %118 = vector.broadcast %117 : vector<1x64xf32> to vector<64x64xf32>
    %119 = arith.mulf %102, %118 : vector<64x64xf32>
    %120 = arith.addf %119, %1 : vector<64x64xf32>
    %cst_82 = arith.constant 0.000000e+00 : f32
    %121 = vector.broadcast %cst_82 : f32 to vector<64x64xf32>
    %122 = arith.maximumf %120, %121 : vector<64x64xf32>
    %c0_83 = arith.constant 0 : index
    %c0_84 = arith.constant 0 : index
    %c0_85 = arith.constant 0 : index
    %123 = vector.load %arg10[%c0_83, %c0_84, %c0_85] : memref<1x64x64xf32, #tpu.memory_space<vmem>>, vector<1x64x64xf32>
    %124 = vector.shape_cast %123 : vector<1x64x64xf32> to vector<64x64xf32>
    %125 = vector.shape_cast %122 : vector<64x64xf32> to vector<1x64x64xf32>
    tpu.vector_store %arg10[%c0_83, %c0_84, %c0_85], %125 {strides = array<i32>} : memref<1x64x64xf32, #tpu.memory_space<vmem>>, vector<1x64x64xf32>,
    return
  }
  func.func @transform_0(%arg0: i32) -> (i32, i32, i32) {
    %c0_i32 = arith.constant 0 : i32
    %c0_i32_0 = arith.constant 0 : i32
    %c0_i32_1 = arith.constant 0 : i32
    return %arg0, %c0_i32, %c0_i32_0 : i32, i32, i32
  }
  func.func @transform_1(%arg0: i32) -> (i32, i32) {
    %c0_i32 = arith.constant 0 : i32
    %c0_i32_0 = arith.constant 0 : i32
    %c0_i32_1 = arith.constant 0 : i32
    return %c0_i32, %c0_i32_0 : i32, i32
  }
  func.func @transform_2(%arg0: i32) -> (i32, i32) {
    %c0_i32 = arith.constant 0 : i32
    %c0_i32_0 = arith.constant 0 : i32
    %c0_i32_1 = arith.constant 0 : i32
    return %c0_i32, %c0_i32_0 : i32, i32
  }
  func.func @transform_3(%arg0: i32) -> (i32, i32, i32) {
    %c0_i32 = arith.constant 0 : i32
    %c0_i32_0 = arith.constant 0 : i32
    %c0_i32_1 = arith.constant 0 : i32
    %c0_i32_2 = arith.constant 0 : i32
    return %c0_i32, %c0_i32_0, %c0_i32_1 : i32, i32, i32
  }
  func.func @transform_4(%arg0: i32) -> (i32, i32) {
    %c0_i32 = arith.constant 0 : i32
    %c0_i32_0 = arith.constant 0 : i32
    %c0_i32_1 = arith.constant 0 : i32
    return %c0_i32, %c0_i32_0 : i32, i32
  }
  func.func @transform_5(%arg0: i32) -> (i32, i32) {
    %c0_i32 = arith.constant 0 : i32
    %c0_i32_0 = arith.constant 0 : i32
    %c0_i32_1 = arith.constant 0 : i32
    return %c0_i32, %c0_i32_0 : i32, i32
  }
  func.func @transform_6(%arg0: i32) -> (i32, i32) {
    %c0_i32 = arith.constant 0 : i32
    %c0_i32_0 = arith.constant 0 : i32
    %c0_i32_1 = arith.constant 0 : i32
    return %c0_i32, %c0_i32_0 : i32, i32
  }
  func.func @transform_7(%arg0: i32) -> (i32, i32) {
    %c0_i32 = arith.constant 0 : i32
    %c0_i32_0 = arith.constant 0 : i32
    %c0_i32_1 = arith.constant 0 : i32
    return %c0_i32, %c0_i32_0 : i32, i32
  }
  func.func @transform_8(%arg0: i32) -> (i32, i32) {
    %c0_i32 = arith.constant 0 : i32
    %c0_i32_0 = arith.constant 0 : i32
    %c0_i32_1 = arith.constant 0 : i32
    return %c0_i32, %c0_i32_0 : i32, i32
  }
  func.func @transform_9(%arg0: i32) -> (i32, i32, i32) {
    %c0_i32 = arith.constant 0 : i32
    %c0_i32_0 = arith.constant 0 : i32
    %c0_i32_1 = arith.constant 0 : i32
    return %arg0, %c0_i32, %c0_i32_0 : i32, i32, i32
  }
}

</mosaic_0001>

<bundles_post_ra>
// kernel: bottleneck_forward.1
= control target key start
LH: loop header
LB: loop body
LE: loop exit
PB: predicated region body
PF: predicated region fallthrough
CT: control target
= control target key end

     0   :  { %s2896_s0 = inlined_call_operand.hbm [shape: f32[2,64,64], index: 0, kind: input, shape index: {}]   ;;  %s2897_s1 = inlined_call_operand.vmem [shape: f32[64,16], index: 1, kind: input, shape index: {}]   ;;  %s2898_s2 = inlined_call_operand.vmem [shape: f32[1,16], index: 2, kind: input, shape index: {}]   ;;  %s2899_s3 = inlined_call_operand.vmem [shape: f32[9,16,16], index: 3, kind: input, shape index: {}]   ;;  %s2900_s4 = inlined_call_operand.vmem [shape: f32[1,16], index: 4, kind: input, shape index: {}]   ;;  %s2901_s5 = inlined_call_operand.hbm [shape: f32[16,64], index: 5, kind: input, shape index: {}]   ;;  %s2902_s6 = inlined_call_operand.vmem [shape: f32[1,64], index: 6, kind: input, shape index: {}]   ;;  %s2903_s7 = inlined_call_operand.vmem [shape: f32[64,4], index: 7, kind: input, shape index: {}]   ;;  %s2904_s8 = inlined_call_operand.vmem [shape: f32[4,64], index: 8, kind: input, shape index: {}]   ;;  %s2905_s9 = inlined_call_operand.hbm [shape: f32[2,64,64], index: 9, kind: output, shape index: {}]  }
   0x1   :  { %2912 = sst [smem:[#allocation14_spill]] %s2901_s5 }
   0x2   :  { %14 = vsyncpa [#allocation4], 0 }
   0x3   :  { %16 = vsyncpa [#allocation4 + $0x1], 0 }
   0x4   :  { %17 = vsyncpa [#allocation7], 0 }
   0x5   :  { %18 = vsyncpa [#allocation5], 0 }
   0x6   :  { %20 = vsyncpa [#allocation5 + $0x1], 0  ;;  %s2118_s30 = smov 0   ;;  %s2120_s10 = smov 0  }
   0x7   :  { %s2122_s11 = smov 0   ;;  %s2124_s12 = smov 0  }
   0x8 LB: > { %2913 = sst [smem:[#allocation12_spill]] %s2055_s11  ;;  %s2139_s13 = sadd.s32 4294967295, %s2059_s12   ;;  %s2059_s12 = sphi %s2124_s12, %s2978_s12   ;;  %s2055_s11 = sphi %s2122_s11, %s2975_s11   ;;  %s2051_s10 = sphi %s2120_s10, %s2977_s10   ;;  %s2047_s30 = sphi %s2118_s30, %s2976_s30  }
   0x9   : > { %s1717_s14 = sadd.s32 4294967294, %s2059_s12   ;;  %p46_p0 = scmp.ne.s32.totalorder %s2051_s10, %s2047_s30 }
   0xa   : > { %p47_p1 = scmp.eq.s32.totalorder %s2139_s13, 0  ;;  %p238_p2 = scmp.eq.s32.totalorder %s2139_s13, 1 }
   0xb   : > { %p244_p3 = scmp.eq.s32.totalorder %s1717_s14, 1  ;;  %p1718_p5 = scmp.ge.s32.totalorder %s2059_s12, 1 }
   0xc   : > { %p2148_p4 = por %p47_p1, %p46_p0  ;;  %p251_p7 = scmp.lt.s32.totalorder %s2059_s12, 3 }
   0xd   : > { %p2153_p6 = por %p244_p3, %p46_p0  ;;  %s2916_s5 = sld [smem:[#allocation14_spill]] }
   0xe   : > { %p2161_p8 = pnand %p1718_p5, %p251_p7  ;;  %s2061_s21 = smov [#allocation6]  }
   0xf   : > { %s276_s22 = sshll.u32 %s2061_s21, 4  ;;  %s2171_s23 = sadd.s32 1, %s2059_s12   ;;  %s277_s22 = int_to_ptr.vmem [resolvable:$true] %s276_s22 }
  0x10   : > { %p1857_p9 = pneg %p2161_p8  ;;  %s2906_s24 = smov 128  }
  0x11   : > { %s2907_s25 = smov 8   ;;  %s30_s26 = ssub.s32 %s2059_s12, %s2171_s23 }
  0x12   : > { %p1858_p10 = pnand %p1857_p9, %p47_p1  ;;  %s33_s27 = sadd.s32 1, %s2055_s11 }
  0x13   : > { %s274_s19 = sshll.u32 %s2916_s5, 4  ;;  %p31_p12 = scmp.eq.s32.totalorder %s30_s26, 0  ;;  %s275_s19 = int_to_ptr.hbm [resolvable:$true] %s274_s19 }
  0x14   : > { %1860 = dma.hbm_to_vmem [thread:$0]  (!%p1858_p10), %s275_s19, 256, %s277_s22, [#allocation7], %s2906_s24, %s2906_s24, %s2907_s25  }
  0x15   : > { %p40_p13 = scmp.ne.s32.totalorder %s2055_s11, %s2051_s10  ;;  %p41_p0 = scmp.eq.s32.totalorder %s2059_s12, 0 }
  0x16   : > { %s2183_s28 = scalar_select %p31_p12, %s2055_s11, %s33_s27  }
  0x17   : > { %p2187_p3 = por %p238_p2, %p40_p13  ;;  %p1870_p5 = scmp.lt.s32.totalorder %s2059_s12, 2 }
  0x18   : > { %2918 = sst [smem:[#allocation13_spill]] %s2183_s28  ;;  %s299_s14 = sand.u32 1, %s2055_s11  }
  0x19   : > { %s1841_s17 = sshll.u32 %s2059_s12, 6  ;;  %p42_p7 = por %p41_p0, %p40_p13 }
  0x1a   : > { %s1721_s18 = sshll.u32 %s299_s14, 6  ;;  %s308_s19 = scalar_lea.hbm %s2896_s0, %s1841_s17 }
  0x1b   : > { %s309_s22 = sshll.u32 %s308_s19, 4  ;;  %s303_s26 = scalar_lea.vmem [#allocation3], %s1721_s18  ;;  %s310_s22 = int_to_ptr.hbm [resolvable:$true] %s309_s22 }
  0x1c   : > { %s311_s24 = sshll.u32 %s303_s26, 4  ;;  %p2197_p9 = pnand %p1870_p5, %p42_p7  ;;  %s312_s24 = int_to_ptr.vmem [resolvable:$true] %s311_s24 }
  0x1d   : > { %s300_s25 = scalar_lea.sflag [#allocation4], %s299_s14  ;;  %s1959_s28 = sshra.s32 %s310_s22, 4  ;;  %s1960_s28 = int_to_ptr.hbm [resolvable:$true] %s1959_s28 }
  0x1e   : > { %s1961_s11 = scalar_lea.hbm %s1960_s28, 64  ;;  %p1963_p10 = pneg %p2197_p9 }
  0x1f   : > { %p1962_p2 = scmp.ne.s32.totalorder %s1960_s28, %s1961_s11  ;;  %s1966_s18 = scalar_lea.hbm %s2896_s0, 128 }
  0x20   : > { %p1967_p0 = scmp.lt.s32.totalorder %s1960_s28, %s2896_s0  ;;  %p1968_p5 = scmp.lt.s32.totalorder %s1966_s18, %s1961_s11 }
  0x21   : > { %p1964_p12 = pnand %p1963_p10, %p1962_p2 }
  0x22   : > { %p1969_p7 = por %p1968_p5, %p1967_p0 }
  0x23   : > { %p1965_p13 = pneg %p1964_p12 }
  0x25   : > { %p1970_p11 = pnand %p1969_p7, %p1965_p13 }
  0x27   : > { %1973 = shalt.err (!%p1970_p11)
}
  0x28   : > { %s2921_s14 = smov 8   ;;  %s2922_s26 = smov 128  }
  0x29   : > { %1864 = dma.hbm_to_vmem [thread:$0]  (!%p2197_p9), %s310_s22, 1024, %s312_s24, %s300_s25, %s2922_s26, %s2922_s26, %s2921_s14  }
  0x2a   : > { %323 = sbr.rel (%p2161_p8) target bundleno = 972 (0x3cc), region = 56  ;;  %s2217_s5 = sand.u32 (!%p2161_p8), 1, %s2051_s10  }
  0x2b   : > { %s1725_s11 = sshll.u32 (!%p2161_p8), %s2217_s5, 6  ;;  %s326_s28 = scalar_lea.sflag (!%p2161_p8), [#allocation4], %s2217_s5 }
  0x2c   : > { %s2223_s17 = scalar_lea.vmem (!%p2161_p8), [#allocation3], %s1725_s11 }
  0x2f   : > { %2034 = dma.done.wait (%p2148_p4), %s326_s28, 1024  }
  0x30   : > { %2036 = vsyncadd (%p2148_p4), %s326_s28, 4294966272 }
  0x31   : > { %2038 = dma.done.wait (%p47_p1), [#allocation7], 256  }
  0x32   : > { %2040 = vsyncadd (%p47_p1), [#allocation7], 4294967040  ;;  %v385_v0 = vld [vmem:[%s2897_s1 + $0x38] sm:$0xff]  ;;  %v384_v1 = vld [vmem:[%s2897_s1 + $0x30] sm:$0xff]  ;;  %vm2909_vm0 = vcmask 523264   ;;  %vm464_vm1 = vcmask 130048   ;;  %v477_v20 = vlaneseq }
  0x33   : > { %423 = vmatpush.msra.mxu0 %v385_v0  ;;  %v383_v2 = vld [vmem:[%s2897_s1 + $0x28] sm:$0xff]  ;;  %v382_v3 = vld [vmem:[%s2897_s1 + $0x20] sm:$0xff]  ;;  %v381_v4 = vld [vmem:[%s2897_s1 + $0x18] sm:$0xff]  ;;  %v2064_v14 = vmov 0.0   ;;  %s1842_s27 = sshll.u32 %s2139_s13, 6  ;;  %s369_s21 = scalar_lea.vmem [#allocation8], %s1725_s11 }
  0x34   : > { %v380_v5 = vld [vmem:[%s2897_s1 + $0x10] sm:$0xff]  ;;  %v379_v6 = vld [vmem:[%s2897_s1 + $0x8] sm:$0xff]  ;;  %v378_v7 = vld [vmem:[%s2897_s1] sm:$0xff]  ;;  %466 = vst.msk [vmem:[#allocation2 + $0x8] sm:$0xff] %vm464_vm1, %v2064_v14  ;;  %v2284_v21 = vshrl.u32 %v477_v20, 7  ;;  %v2939_v20 = vmov 0  ;;  %s1630_s15 = scalar_lea.hbm %s2905_s9, %s1842_s27 }
  0x35   : > { %424 = vmatpush.msra.mxu0 %v384_v1  ;;  %v370_v8 = vld [vmem:[%s2223_s17] sm:$0xff]  ;;  %v371_v9 = vld [vmem:[%s2223_s17 + $0x8] sm:$0xff]  ;;  %v372_v10 = vld [vmem:[%s2223_s17 + $0x10] sm:$0xff]  ;;  %465 = vst.msk [vmem:[#allocation2] sm:$0xff] %vm464_vm1, %v2064_v14  ;;  %s1631_s19 = sshll.u32 %s369_s21, 4  ;;  %s1633_s14 = sshll.u32 %s1630_s15, 4  ;;  %s1632_s19 = int_to_ptr.vmem [resolvable:$true] %s1631_s19  ;;  %s1634_s14 = int_to_ptr.hbm [resolvable:$true] %s1633_s14 }
  0x36   : > { %v373_v11 = vld [vmem:[%s2223_s17 + $0x18] sm:$0xff]  ;;  %v1736_v13 = vld [vmem:[%s2899_s3 + $0x10] sm:$0xff]  ;;  %467 = vst.msk [vmem:[#allocation2 + $0x50] sm:$0xff] %vm464_vm1, %v2064_v14  ;;  %v374_v15 = vld [vmem:[%s2223_s17 + $0x20] sm:$0xff]  ;;  %v490_v23 = vand.u32 7, %v2284_v21  ;;  %v479_v37 = vadd.s32 8, %v2284_v21 }
  0x37   : > { %425 = vmatpush.msra.mxu0 %v383_v2  ;;  %v1737_v12 = vld [vmem:[%s2899_s3 + $0x18] sm:$0xff]  ;;  %468 = vst.msk [vmem:[#allocation2 + $0x58] sm:$0xff] %vm464_vm1, %v2064_v14  ;;  %v375_v16 = vld [vmem:[%s2223_s17 + $0x28] sm:$0xff]  ;;  %v376_v17 = vld [vmem:[%s2223_s17 + $0x30] sm:$0xff]  ;;  %v480_v44 = vadd.s32 16, %v2284_v21  ;;  %v481_v58 = vadd.s32 24, %v2284_v21 }
  0x38   : > { %1843 = vmatpush.msra.mxu1 %v1737_v12  ;;  %v377_v18 = vld [vmem:[%s2223_s17 + $0x38] sm:$0xff]  ;;  %v615_v22 = vld [vmem:[%s2899_s3 + $0x8] sm:$0xff]  ;;  %v614_v24 = vld [vmem:[%s2899_s3] sm:$0xff]  ;;  %vm2293_vm2 = vcmp.ge.s32.totalorder %v490_v23, 1  ;;  %v497_v39 = vand.u32 7, %v479_v37  ;;  %vm2331_vm4 = vcmp.le.s32.totalorder %v490_v23, 6 }
  0x39   : > { %426 = vmatpush.msra.mxu0 %v382_v3  ;;  %1845 = vmatpush.msra.mxu2 %v615_v22  ;;  %v1755_v28 = vld [vmem:[%s2899_s3 + $0x28] sm:$0xff]  ;;  %v1754_v29 = vld [vmem:[%s2899_s3 + $0x20] sm:$0xff]  ;;  %v1765_v33 = vld [vmem:[%s2899_s3 + $0x38] sm:$0xff]  ;;  %v504_v52 = vand.u32 7, %v480_v44  ;;  %v511_v2 = vand.u32 7, %v481_v58  ;;  %s1619_s11 = scalar_lea.sflag [#allocation5], %s2217_s5 }
  0x3a   : > { %1844 = vmatpush.msra.mxu1 %v1736_v13  ;;  %1847 = vmatpush.msra.mxu3 %v1755_v28  ;;  %v1775_v30 = vld [vmem:[%s2899_s3 + $0x48] sm:$0xff]  ;;  %v1794_v32 = vld [vmem:[%s2899_s3 + $0x60] sm:$0xff]  ;;  %vm2327_vm3 = vcmp.ge.s32.totalorder %v497_v39, 1  ;;  %v1764_v53 = vld [vmem:[%s2899_s3 + $0x30] sm:$0xff]  ;;  %vm2361_vm6 = vcmp.le.s32.totalorder %v497_v39, 6  ;;  %s2009_s24 = scalar_lea.hbm %s2905_s9, 128 }
  0x3b   : > { %427 = vmatpush.msra.mxu0 %v381_v4  ;;  %v616_v19 = vld [vmem:[#allocation2 + $0x8] sm:$0xff]  ;;  %1846 = vmatpush.msra.mxu2 %v614_v24  ;;  %v2321_v34 = vld [vmem:[%s2898_s2] ss:$0 sm:$0xff]  ;;  %vm2357_vm5 = vcmp.ge.s32.totalorder %v504_v52, 1  ;;  %vm2388_vm7 = vcmp.ge.s32.totalorder %v511_v2, 1  ;;  %vm2392_vm8 = vcmp.le.s32.totalorder %v504_v52, 6 }
  0x3c   : > { %v598_v26 = vld [vmem:[#allocation2 + $0x7] sm:$0xff]  ;;  %1848 = vmatpush.msra.mxu3 %v1754_v29  ;;  %906 = vmatpush.msrb.mxu1 %v1765_v33  ;;  %vm2426_vm10 = vcmp.le.s32.totalorder %v511_v2, 6 }
  0x3d   : > { %428 = vmatpush.msra.mxu0 %v380_v5  ;;  %v606_v27 = vsel %vm2293_vm2, %v598_v26, 0.0  ;;  %990 = vmatpush.msrb.mxu2 %v1775_v30  ;;  %v1795_v31 = vld [vmem:[%s2899_s3 + $0x68] sm:$0xff]  ;;  %v1774_v51 = vld [vmem:[%s2899_s3 + $0x40] sm:$0xff]  ;;  %v2940_v20 = vsel %vm2426_vm10, 4294967295, %v2939_v20 }
  0x3e   : > { %907 = vmatpush.msrb.mxu1 %v1764_v53  ;;  %v1815_v33 = vld [vmem:[%s2899_s3 + $0x88] sm:$0xff]  ;;  %v1784_v53 = vld [vmem:[%s2899_s3 + $0x50] sm:$0xff]  ;;  %v1814_v25 = vld [vmem:[%s2899_s3 + $0x80] sm:$0xff] }
  0x3f   : > { %429 = vmatpush.msra.mxu0 %v379_v6  ;;  %991 = vmatpush.msrb.mxu2 %v1774_v51 }
  0x41   : > { %430 = vmatpush.msra.mxu0 %v378_v7  ;;  %v482_v7 = vadd.s32 32, %v2284_v21 }
  0x42   : > { %1728 = vmatmul.msk.f32.vlgmr.msra.gmra.mxu0 %vm2909_vm0, %v370_v8 }
  0x43   : > { %665 = vmatpush.msrb.mxu0 %v1737_v12 }
  0x45   : > { %666 = vmatpush.msrb.mxu0 %v1736_v13 }
  0x47   : > { %730 = vmatpush.msra.mxu0 %v615_v22  ;;  %v483_v22 = vadd.s32 40, %v2284_v21 }
  0x49   : > { %731 = vmatpush.msra.mxu0 %v614_v24 }
  0x4a   : > { %1729 = vmatmul.msk.f32.gmra.mxu0 %vm2909_vm0, %v371_v9 }
  0x52   : > { %1730 = vmatmul.msk.f32.gmra.mxu0 %vm2909_vm0, %v372_v10 }
  0x5a   : > { %1731 = vmatmul.msk.f32.gmra.mxu0 %vm2909_vm0, %v373_v11 }
  0x62   : > { %1732 = vmatmul.msk.f32.gmra.mxu0 %vm2909_vm0, %v374_v15  ;;  %v518_v15 = vand.u32 7, %v482_v7 }
  0x64   : > { %vm2422_vm9 = vcmp.ge.s32.totalorder %v518_v15, 1  ;;  %vm2469_vm12 = vcmp.le.s32.totalorder %v518_v15, 6 }
  0x6a   : > { %1733 = vmatmul.msk.f32.gmra.mxu0 %vm2909_vm0, %v375_v16 }
  0x72   : > { %1734 = vmatmul.msk.f32.gmra.mxu0 %vm2909_vm0, %v376_v17 }
  0x7a   : > { %1735 = vmatmul.msk.f32.gmra.mxu0 %vm2909_vm0, %v377_v18 }
  0x82   : > { %1738 = vmatmul.msk.f32.vlgmr.msrb.gmra.mxu0 %vm464_vm1, %v616_v19 }
  0x83   : > { %814 = vmatpush.msrb.mxu0 %v1755_v28 }
  0x85   : > { %815 = vmatpush.msrb.mxu0 %v1754_v29 }
  0x8a   : > { %1746 = vmatmul.msk.f32.vlgmr.msra.gmra.mxu0 %vm464_vm1, %v606_v27 }
  0x8b   : > { %1174 = vmatpush.msra.mxu0 %v1795_v31  ;;  %v525_v31 = vand.u32 7, %v483_v22 }
  0x8d   : > { %1175 = vmatpush.msra.mxu0 %v1794_v32  ;;  %vm2465_vm11 = vcmp.ge.s32.totalorder %v525_v31, 1  ;;  %vm2506_vm14 = vcmp.le.s32.totalorder %v525_v31, 6 }
  0xbf   : > { %v432_v35 = vpop.f32.mrf.mxu0 }
  0xc0   : > { %v433_v36 = vadd.f32 %v2321_v34, %v432_v35  ;;  %v1785_v35 = vld [vmem:[%s2899_s3 + $0x58] sm:$0xff] }
  0xc1   : > { %1082 = vmatpush.msrb.mxu3 %v1785_v35 }
  0xc2   : > { %v456_v38 = vmax.f32 %v433_v36, 0.0  ;;  %v1805_v36 = vld [vmem:[%s2899_s3 + $0x78] sm:$0xff] }
  0xc3   : > { %1083 = vmatpush.msrb.mxu3 %v1784_v53 }
  0xc4   : > { %469 = vst.msk [vmem:[#allocation2 + $0x10] sm:$0xff] %vm464_vm1, %v456_v38 }
  0xc7   : > { %v435_v40 = vpop.f32.mrf.mxu0 }
  0xc8   : > { %v436_v41 = vadd.f32 %v2321_v34, %v435_v40 }
  0xca   : > { %v457_v45 = vmax.f32 %v436_v41, 0.0  ;;  %v484_v41 = vadd.s32 48, %v2284_v21 }
  0xcb   : > { %v2336_v46 = vld [vmem:[#allocation2 + $0x10] sm:$0xff] }
  0xcc   : > { %v2338_v47 = vld [vmem:[#allocation2 + $0xf] sm:$0xff]  ;;  %470 = vst.msk [vmem:[#allocation2 + $0x18] sm:$0xff] %vm464_vm1, %v457_v45  ;;  %1739 = vmatmul.msk.f32.vlgmr.msra.gmra.mxu1 %vm464_vm1, %v2336_v46 }
  0xcd   : > { %v757_v48 = vld [vmem:[#allocation2 + $0x9] sm:$0xff]  ;;  %v607_v49 = vsel %vm2327_vm3, %v2338_v47, 0.0  ;;  %1258 = vmatpush.msra.mxu1 %v1805_v36 }
  0xce   : > { %v765_v50 = vsel %vm2331_vm4, %v757_v48, 0.0  ;;  %1747 = vmatmul.msk.f32.vlgmr.msra.gmra.mxu2 %vm464_vm1, %v607_v49 }
  0xcf   : > { %1756 = vmatmul.msk.f32.vlgmr.msrb.gmra.mxu0 %vm464_vm1, %v765_v50  ;;  %v438_v54 = vpop.f32.mrf.mxu0  ;;  %1350 = vmatpush.msra.mxu2 %v1815_v33 }
  0xd0   : > { %v439_v55 = vadd.f32 %v2321_v34, %v438_v54  ;;  %v532_v54 = vand.u32 7, %v484_v41 }
  0xd1   : > { %1351 = vmatpush.msra.mxu2 %v1814_v25 }
  0xd2   : > { %v458_v59 = vmax.f32 %v439_v55, 0.0  ;;  %vm2502_vm13 = vcmp.ge.s32.totalorder %v532_v54, 1  ;;  %vm2540_vm0 = vcmp.le.s32.totalorder %v532_v54, 6 }
  0xd3   : > { %v2366_v60 = vld [vmem:[#allocation2 + $0x18] sm:$0xff] }
  0xd4   : > { %v2368_v61 = vld [vmem:[#allocation2 + $0x17] sm:$0xff]  ;;  %471 = vst.msk [vmem:[#allocation2 + $0x20] sm:$0xff] %vm464_vm1, %v458_v59  ;;  %1740 = vmatmul.msk.f32.gmra.mxu1 %vm464_vm1, %v2366_v60 }
  0xd5   : > { %v2370_v62 = vld [vmem:[#allocation2 + $0x11] sm:$0xff]  ;;  %v608_v63 = vsel %vm2357_vm5, %v2368_v61, 0.0  ;;  %v1125_v1 = vsel %vm2293_vm2, %v2368_v61, 0.0 }
  0xd6   : > { %v766_v0 = vsel %vm2361_vm6, %v2370_v62, 0.0  ;;  %1748 = vmatmul.msk.f32.gmra.mxu2 %vm464_vm1, %v608_v63 }
  0xd7   : > { %1757 = vmatmul.msk.f32.vlgmr.msra.gmra.mxu3 %vm464_vm1, %v766_v0  ;;  %1796 = vmatmul.msk.f32.vlgmr.msra.gmra.mxu0 %vm464_vm1, %v1125_v1  ;;  %v441_v3 = vpop.f32.mrf.mxu0  ;;  %v485_v1 = vadd.s32 56, %v2284_v21 }
  0xd8   : > { %v442_v4 = vadd.f32 %v2321_v34, %v441_v3 }
  0xda   : > { %v459_v8 = vmax.f32 %v442_v4, 0.0 }
  0xdb   : > { %v2397_v9 = vld [vmem:[#allocation2 + $0x20] sm:$0xff] }
  0xdc   : > { %v2399_v10 = vld [vmem:[#allocation2 + $0x1f] sm:$0xff]  ;;  %472 = vst.msk [vmem:[#allocation2 + $0x28] sm:$0xff] %vm464_vm1, %v459_v8  ;;  %1741 = vmatmul.msk.f32.gmra.mxu1 %vm464_vm1, %v2397_v9 }
  0xdd   : > { %v2401_v11 = vld [vmem:[#allocation2 + $0x19] sm:$0xff]  ;;  %v609_v12 = vsel %vm2388_vm7, %v2399_v10, 0.0  ;;  %v1126_v14 = vsel %vm2327_vm3, %v2399_v10, 0.0  ;;  %v859_v53 = vsel %vm2357_vm5, %v2399_v10, 0.0 }
  0xde   : > { %v767_v13 = vsel %vm2392_vm8, %v2401_v11, 0.0  ;;  %1749 = vmatmul.msk.f32.gmra.mxu2 %vm464_vm1, %v609_v12  ;;  %v1301_v16 = vsel %vm2331_vm4, %v2401_v11, 0.0  ;;  %v1034_v42 = vsel %vm2361_vm6, %v2401_v11, 0.0 }
  0xdf   : > { %1758 = vmatmul.msk.f32.gmra.mxu3 %vm464_vm1, %v767_v13  ;;  %1797 = vmatmul.msk.f32.gmra.mxu0 %vm464_vm1, %v1126_v14  ;;  %v444_v17 = vpop.f32.mrf.mxu0  ;;  %v539_v13 = vand.u32 7, %v485_v1 }
  0xe0   : > { %v445_v18 = vadd.f32 %v2321_v34, %v444_v17 }
  0xe1   : > { %vm2536_vm15 = vcmp.ge.s32.totalorder %v539_v13, 1 }
  0xe2   : > { %v460_v23 = vmax.f32 %v445_v18, 0.0 }
  0xe3   : > { %v2431_v24 = vld [vmem:[#allocation2 + $0x28] sm:$0xff] }
  0xe4   : > { %v2433_v26 = vld [vmem:[#allocation2 + $0x27] sm:$0xff]  ;;  %473 = vst.msk [vmem:[#allocation2 + $0x30] sm:$0xff] %vm464_vm1, %v460_v23  ;;  %1742 = vmatmul.msk.f32.gmra.mxu1 %vm464_vm1, %v2431_v24 }
  0xe5   : > { %v2435_v27 = vld [vmem:[#allocation2 + $0x21] sm:$0xff]  ;;  %v610_v28 = vsel %vm2422_vm9, %v2433_v26, 0.0  ;;  %v1127_v30 = vsel %vm2357_vm5, %v2433_v26, 0.0  ;;  %v860_v56 = vsel %vm2388_vm7, %v2433_v26, 0.0 }
  0xe6   : > { %v768_v29 = vsel %vm2426_vm10, %v2435_v27, 0.0  ;;  %1750 = vmatmul.msk.f32.gmra.mxu2 %vm464_vm1, %v610_v28  ;;  %v1302_v32 = vsel %vm2361_vm6, %v2435_v27, 0.0  ;;  %v1035_v10 = vsel %vm2392_vm8, %v2435_v27, 0.0 }
  0xe7   : > { %1759 = vmatmul.msk.f32.gmra.mxu3 %vm464_vm1, %v768_v29  ;;  %1798 = vmatmul.msk.f32.gmra.mxu0 %vm464_vm1, %v1127_v30  ;;  %v447_v37 = vpop.f32.mrf.mxu0 }
  0xe8   : > { %v448_v38 = vadd.f32 %v2321_v34, %v447_v37  ;;  %v857_v37 = vsel %vm2293_vm2, %v2338_v47, 0.0  ;;  %v1804_v47 = vld [vmem:[%s2899_s3 + $0x70] sm:$0xff]  ;;  %vm2955_vm2 = vnez %v2940_v20 }
  0xe9   : > { %1259 = vmatpush.msra.mxu1 %v1804_v47 }
  0xea   : > { %v461_v44 = vmax.f32 %v448_v38, 0.0 }
  0xeb   : > { %v2474_v45 = vld [vmem:[#allocation2 + $0x30] sm:$0xff] }
  0xec   : > { %v2476_v48 = vld [vmem:[#allocation2 + $0x2f] sm:$0xff]  ;;  %474 = vst.msk [vmem:[#allocation2 + $0x38] sm:$0xff] %vm464_vm1, %v461_v44  ;;  %1743 = vmatmul.msk.f32.gmra.mxu1 %vm464_vm1, %v2474_v45 }
  0xed   : > { %v2478_v49 = vld [vmem:[#allocation2 + $0x29] sm:$0xff]  ;;  %v611_v50 = vsel %vm2465_vm11, %v2476_v48, 0.0  ;;  %v1128_v52 = vsel %vm2388_vm7, %v2476_v48, 0.0  ;;  %v861_v54 = vsel %vm2422_vm9, %v2476_v48, 0.0 }
  0xee   : > { %v769_v51 = vsel %vm2469_vm12, %v2478_v49, 0.0  ;;  %1751 = vmatmul.msk.f32.gmra.mxu2 %vm464_vm1, %v611_v50  ;;  %v1303_v55 = vsel %vm2392_vm8, %v2478_v49, 0.0  ;;  %v1036_v5 = vsel %vm2955_vm2, %v2478_v49, 0.0 }
  0xef   : > { %1760 = vmatmul.msk.f32.gmra.mxu3 %vm464_vm1, %v769_v51  ;;  %1799 = vmatmul.msk.f32.gmra.mxu0 %vm464_vm1, %v1128_v52  ;;  %v450_v58 = vpop.f32.mrf.mxu0  ;;  %v1033_v52 = vsel %vm2331_vm4, %v2370_v62, 0.0 }
  0xf0   : > { %v451_v59 = vadd.f32 %v2321_v34, %v450_v58 }
  0xf2   : > { %v462_v2 = vmax.f32 %v451_v59, 0.0 }
  0xf3   : > { %v2511_v3 = vld [vmem:[#allocation2 + $0x38] sm:$0xff] }
  0xf4   : > { %v2513_v4 = vld [vmem:[#allocation2 + $0x37] sm:$0xff]  ;;  %475 = vst.msk [vmem:[#allocation2 + $0x40] sm:$0xff] %vm464_vm1, %v462_v2  ;;  %1744 = vmatmul.msk.f32.gmra.mxu1 %vm464_vm1, %v2511_v3 }
  0xf5   : > { %v2515_v7 = vld [vmem:[#allocation2 + $0x31] sm:$0xff]  ;;  %v612_v8 = vsel %vm2502_vm13, %v2513_v4, 0.0  ;;  %v1129_v12 = vsel %vm2422_vm9, %v2513_v4, 0.0  ;;  %v862_v26 = vsel %vm2465_vm11, %v2513_v4, 0.0 }
  0xf6   : > { %v770_v21 = vsel %vm2506_vm14, %v2515_v7, 0.0  ;;  %1752 = vmatmul.msk.f32.gmra.mxu2 %vm464_vm1, %v612_v8  ;;  %v1304_v14 = vsel %vm2426_vm10, %v2515_v7, 0.0  ;;  %vm2564_vm10 = vcmp.le.s32.totalorder %v539_v13, 6  ;;  %v1037_v19 = vsel %vm2469_vm12, %v2515_v7, 0.0 }
  0xf7   : > { %1761 = vmatmul.msk.f32.gmra.mxu3 %vm464_vm1, %v770_v21  ;;  %1800 = vmatmul.msk.f32.gmra.mxu0 %vm464_vm1, %v1129_v12  ;;  %v453_v15 = vpop.f32.mrf.mxu0  ;;  %v1300_v12 = vld [vmem:[#allocation2 + $0x51] sm:$0xff] }
  0xf8   : > { %v454_v17 = vadd.f32 %v2321_v34, %v453_v15  ;;  %v1216_v15 = vld [vmem:[#allocation2 + $0x50] sm:$0xff] }
  0xfa   : > { %v463_v23 = vmax.f32 %v454_v17, 0.0  ;;  %v1308_v17 = vsel %vm2564_vm10, %v1300_v12, 0.0 }
  0xfb   : > { %v2544_v28 = vld [vmem:[#allocation2 + $0x40] sm:$0xff] }
  0xfc   : > { %v605_v29 = vld [vmem:[#allocation2 + $0x3f] sm:$0xff]  ;;  %476 = vst.msk [vmem:[#allocation2 + $0x48] sm:$0xff] %vm464_vm1, %v463_v23  ;;  %1745 = vmatmul.msk.f32.gmra.mxu1 %vm464_vm1, %v2544_v28 }
  0xfd   : > { %v2546_v30 = vld [vmem:[#allocation2 + $0x39] sm:$0xff]  ;;  %v613_v34 = vsel %vm2536_vm15, %v605_v29, 0.0  ;;  %v1130_v33 = vsel %vm2465_vm11, %v605_v29, 0.0  ;;  %v863_v48 = vsel %vm2502_vm13, %v605_v29, 0.0 }
  0xfe   : > { %v771_v31 = vsel %vm2540_vm0, %v2546_v30, 0.0  ;;  %1753 = vmatmul.msk.f32.gmra.mxu2 %vm464_vm1, %v613_v34  ;;  %v1305_v35 = vsel %vm2469_vm12, %v2546_v30, 0.0  ;;  %v1038_v39 = vsel %vm2506_vm14, %v2546_v30, 0.0  ;;  %vm1538_vm12 = vcmask 31744  }
  0xff   : > { %1762 = vmatmul.msk.f32.gmra.mxu3 %vm464_vm1, %v771_v31  ;;  %1801 = vmatmul.msk.f32.gmra.mxu0 %vm464_vm1, %v1130_v33  ;;  %v1405_v31 = vld [vmem:[#allocation6] sm:$0xff] }
 0x103   : > { %v2571_v38 = vld [vmem:[#allocation2 + $0x41] sm:$0xff]  ;;  %v1032_v1 = vld [vmem:[#allocation2 + $0x49] sm:$0xff] }
 0x104   : > { %v1123_v41 = vld [vmem:[#allocation2 + $0x47] sm:$0xff]  ;;  %1766 = vmatmul.msk.f32.vlgmr.msrb.gmra.mxu1 %vm464_vm1, %v857_v37  ;;  %v772_v44 = vsel %vm2564_vm10, %v2571_v38, 0.0  ;;  %v1306_v51 = vsel %vm2506_vm14, %v2571_v38, 0.0  ;;  %v1039_v63 = vsel %vm2540_vm0, %v2571_v38, 0.0  ;;  %v1040_v2 = vsel %vm2564_vm10, %v1032_v1, 0.0 }
 0x105   : > { %v1131_v50 = vsel %vm2502_vm13, %v1123_v41, 0.0  ;;  %v864_v58 = vsel %vm2536_vm15, %v1123_v41, 0.0  ;;  %v948_v59 = vld [vmem:[#allocation2 + $0x48] sm:$0xff]  ;;  %v1307_v7 = vsel %vm2540_vm0, %v1032_v1, 0.0  ;;  %v668_v41 = vpop.f32.mrf.mxu0  ;;  %vm1542_vm0 = vcmask 1043456  }
 0x106   : > { %1776 = vmatmul.msk.f32.vlgmr.msrb.gmra.mxu2 %vm464_vm1, %v2336_v46  ;;  %v858_v46 = vsel %vm2327_vm3, %v2368_v61, 0.0  ;;  %v1124_v61 = vld [vmem:[#allocation2 + $0x4f] sm:$0xff] }
 0x107   : > { %1763 = vmatmul.msk.f32.gmra.mxu3 %vm464_vm1, %v772_v44  ;;  %1802 = vmatmul.msk.f32.gmra.mxu0 %vm464_vm1, %v1131_v50  ;;  %v1132_v62 = vsel %vm2536_vm15, %v1124_v61, 0.0 }
 0x10c   : > { %1767 = vmatmul.msk.f32.gmra.mxu1 %vm464_vm1, %v858_v46 }
 0x10d   : > { %v733_v47 = vpop.f32.mrf.mxu0 }
 0x10e   : > { %1777 = vmatmul.msk.f32.gmra.mxu2 %vm464_vm1, %v2366_v60 }
 0x10f   : > { %1786 = vmatmul.msk.f32.vlgmr.msrb.gmra.mxu3 %vm464_vm1, %v1033_v52  ;;  %1803 = vmatmul.msk.f32.gmra.mxu0 %vm464_vm1, %v1132_v62 }
 0x114   : > { %1768 = vmatmul.msk.f32.gmra.mxu1 %vm464_vm1, %v859_v53 }
 0x116   : > { %1778 = vmatmul.msk.f32.gmra.mxu2 %vm464_vm1, %v2397_v9 }
 0x117   : > { %1787 = vmatmul.msk.f32.gmra.mxu3 %vm464_vm1, %v1034_v42 }
 0x11c   : > { %1769 = vmatmul.msk.f32.gmra.mxu1 %vm464_vm1, %v860_v56  ;;  %v734_v56 = vadd.f32 %v733_v47, %v668_v41 }
 0x11e   : > { %1779 = vmatmul.msk.f32.gmra.mxu2 %vm464_vm1, %v2431_v24 }
 0x11f   : > { %1788 = vmatmul.msk.f32.gmra.mxu3 %vm464_vm1, %v1035_v10 }
 0x124   : > { %1770 = vmatmul.msk.f32.gmra.mxu1 %vm464_vm1, %v861_v54 }
 0x126   : > { %1780 = vmatmul.msk.f32.gmra.mxu2 %vm464_vm1, %v2474_v45 }
 0x127   : > { %1789 = vmatmul.msk.f32.gmra.mxu3 %vm464_vm1, %v1036_v5 }
 0x12c   : > { %1771 = vmatmul.msk.f32.gmra.mxu1 %vm464_vm1, %v862_v26 }
 0x12e   : > { %1781 = vmatmul.msk.f32.gmra.mxu2 %vm464_vm1, %v2511_v3 }
 0x12f   : > { %1790 = vmatmul.msk.f32.gmra.mxu3 %vm464_vm1, %v1037_v19 }
 0x134   : > { %1772 = vmatmul.msk.f32.gmra.mxu1 %vm464_vm1, %v863_v48 }
 0x136   : > { %1782 = vmatmul.msk.f32.gmra.mxu2 %vm464_vm1, %v2544_v28 }
 0x137   : > { %1791 = vmatmul.msk.f32.gmra.mxu3 %vm464_vm1, %v1038_v39 }
 0x13c   : > { %1773 = vmatmul.msk.f32.gmra.mxu1 %vm464_vm1, %v864_v58 }
 0x13e   : > { %1783 = vmatmul.msk.f32.gmra.mxu2 %vm464_vm1, %v948_v59 }
 0x13f   : > { %1792 = vmatmul.msk.f32.gmra.mxu3 %vm464_vm1, %v1039_v63 }
 0x144   : > { %1806 = vmatmul.msk.f32.vlgmr.msra.gmra.mxu1 %vm464_vm1, %v2366_v60 }
 0x146   : > { %1816 = vmatmul.msk.f32.vlgmr.msra.gmra.mxu2 %vm464_vm1, %v1301_v16 }
 0x147   : > { %1793 = vmatmul.msk.f32.gmra.mxu3 %vm464_vm1, %v1040_v2 }
 0x149   : > { %v671_v4 = vpop.f32.mrf.mxu1 }
 0x14c   : > { %1807 = vmatmul.msk.f32.gmra.mxu1 %vm464_vm1, %v2397_v9  ;;  %v817_v53 = vpop.f32.mrf.mxu0 }
 0x14d   : > { %v841_v19 = vadd.f32 %v817_v53, %v734_v56 }
 0x14e   : > { %1817 = vmatmul.msk.f32.gmra.mxu2 %vm464_vm1, %v1302_v32 }
 0x151   : > { %v736_v60 = vpop.f32.mrf.mxu2  ;;  %v674_v21 = vpop.f32.mrf.mxu1 }
 0x152   : > { %v2679_v8 = vadd.f32 %v736_v60, %v671_v4 }
 0x154   : > { %1808 = vmatmul.msk.f32.gmra.mxu1 %vm464_vm1, %v2431_v24  ;;  %v1177_v10 = vpop.f32.mrf.mxu0 }
 0x156   : > { %1818 = vmatmul.msk.f32.gmra.mxu2 %vm464_vm1, %v1303_v55 }
 0x159   : > { %v739_v43 = vpop.f32.mrf.mxu2  ;;  %v677_v57 = vpop.f32.mrf.mxu1 }
 0x15a   : > { %v2688_v9 = vadd.f32 %v739_v43, %v674_v21  ;;  %v820_v32 = vpop.f32.mrf.mxu3 }
 0x15b   : > { %v842_v2 = vadd.f32 %v820_v32, %v2679_v8 }
 0x15c   : > { %1809 = vmatmul.msk.f32.gmra.mxu1 %vm464_vm1, %v2474_v45  ;;  %v1406_v45 = vld [vmem:[#allocation6 + $0x8] sm:$0xff]  ;;  %v1180_v1 = vpop.f32.mrf.mxu0 }
 0x15d   : > { %1449 = vmatpush.msra.mxu3 %v1406_v45 }
 0x15e   : > { %1819 = vmatmul.msk.f32.gmra.mxu2 %vm464_vm1, %v1304_v14 }
 0x15f   : > { %1450 = vmatpush.msra.mxu3 %v1405_v31 }
 0x161   : > { %v742_v11 = vpop.f32.mrf.mxu2  ;;  %v680_v6 = vpop.f32.mrf.mxu1 }
 0x162   : > { %v2697_v16 = vadd.f32 %v742_v11, %v677_v57  ;;  %v2755_v11 = vld [vmem:[%s2900_s4] ss:$0 sm:$0xff] }
 0x164   : > { %1810 = vmatmul.msk.f32.gmra.mxu1 %vm464_vm1, %v2511_v3  ;;  %v823_v3 = vpop.f32.mrf.mxu3 }
 0x166   : > { %1820 = vmatmul.msk.f32.gmra.mxu2 %vm464_vm1, %v1305_v35 }
 0x169   : > { %v745_v24 = vpop.f32.mrf.mxu2  ;;  %v683_v20 = vpop.f32.mrf.mxu1 }
 0x16a   : > { %v2706_v27 = vadd.f32 %v745_v24, %v680_v6 }
 0x16c   : > { %1811 = vmatmul.msk.f32.gmra.mxu1 %vm464_vm1, %v2544_v28  ;;  %v2727_v18 = vpop.f32.mrf.mxu3 }
 0x16e   : > { %1821 = vmatmul.msk.f32.gmra.mxu2 %vm464_vm1, %v1306_v51 }
 0x171   : > { %v748_v40 = vpop.f32.mrf.mxu2  ;;  %v686_v55 = vpop.f32.mrf.mxu1 }
 0x172   : > { %v2715_v49 = vadd.f32 %v748_v40, %v683_v20  ;;  %v843_v40 = vadd.f32 %v823_v3, %v2688_v9 }
 0x174   : > { %1812 = vmatmul.msk.f32.gmra.mxu1 %vm464_vm1, %v948_v59  ;;  %v2731_v29 = vpop.f32.mrf.mxu3 }
 0x176   : > { %1822 = vmatmul.msk.f32.gmra.mxu2 %vm464_vm1, %v1307_v7  ;;  %v1183_v7 = vpop.f32.mrf.mxu0 }
 0x179   : > { %v751_v13 = vpop.f32.mrf.mxu2  ;;  %v689_v0 = vpop.f32.mrf.mxu1 }
 0x17a   : > { %v2721_v14 = vadd.f32 %v751_v13, %v686_v55 }
 0x17c   : > { %1813 = vmatmul.msk.f32.gmra.mxu1 %vm464_vm1, %v1216_v15  ;;  %v2733_v36 = vpop.f32.mrf.mxu3 }
 0x17e   : > { %1823 = vmatmul.msk.f32.gmra.mxu2 %vm464_vm1, %v1308_v17 }
 0x181   : > { %v754_v23 = vpop.f32.mrf.mxu2  ;;  %v909_v28 = vpop.f32.mrf.mxu1 }
 0x182   : > { %v2729_v22 = vadd.f32 %v754_v23, %v689_v0  ;;  %v933_v48 = vadd.f32 %v909_v28, %v841_v19 }
 0x184   : > { %v2735_v44 = vpop.f32.mrf.mxu3 }
 0x189   : > { %v993_v30 = vpop.f32.mrf.mxu2  ;;  %v912_v34 = vpop.f32.mrf.mxu1 }
 0x18a   : > { %v1017_v39 = vadd.f32 %v993_v30, %v933_v48  ;;  %v934_v60 = vadd.f32 %v912_v34, %v842_v2  ;;  %v844_v34 = vadd.f32 %v2727_v18, %v2697_v16 }
 0x18c   : > { %v2737_v51 = vpop.f32.mrf.mxu3 }
 0x191   : > { %v996_v33 = vpop.f32.mrf.mxu2  ;;  %v915_v35 = vpop.f32.mrf.mxu1 }
 0x192   : > { %v1018_v43 = vadd.f32 %v996_v33, %v934_v60  ;;  %v935_v8 = vadd.f32 %v915_v35, %v843_v40  ;;  %v1186_v35 = vpop.f32.mrf.mxu0  ;;  %v846_v60 = vadd.f32 %v2733_v36, %v2715_v49  ;;  %v847_v40 = vadd.f32 %v2735_v44, %v2721_v14 }
 0x194   : > { %v1085_v42 = vpop.f32.mrf.mxu3 }
 0x195   : > { %v1109_v59 = vadd.f32 %v1085_v42, %v1017_v39 }
 0x197   : > { %v1201_v21 = vadd.f32 %v1177_v10, %v1109_v59 }
 0x199   : > { %v999_v37 = vpop.f32.mrf.mxu2  ;;  %v918_v38 = vpop.f32.mrf.mxu1 }
 0x19a   : > { %v1019_v0 = vadd.f32 %v999_v37, %v935_v8  ;;  %v936_v3 = vadd.f32 %v918_v38, %v844_v34 }
 0x19c   : > { %v1088_v26 = vpop.f32.mrf.mxu3 }
 0x19d   : > { %v1110_v24 = vadd.f32 %v1088_v26, %v1018_v43  ;;  %v845_v26 = vadd.f32 %v2731_v29, %v2706_v27 }
 0x19f   : > { %v1202_v12 = vadd.f32 %v1180_v1, %v1110_v24 }
 0x1a1   : > { %v1002_v50 = vpop.f32.mrf.mxu2  ;;  %v921_v25 = vpop.f32.mrf.mxu1 }
 0x1a2   : > { %v1020_v41 = vadd.f32 %v1002_v50, %v936_v3  ;;  %v937_v18 = vadd.f32 %v921_v25, %v845_v26  ;;  %v1189_v50 = vpop.f32.mrf.mxu0 }
 0x1a4   : > { %v1091_v4 = vpop.f32.mrf.mxu3 }
 0x1a5   : > { %v1111_v23 = vadd.f32 %v1091_v4, %v1019_v0 }
 0x1a7   : > { %v1203_v33 = vadd.f32 %v1183_v7, %v1111_v23 }
 0x1a9   : > { %v1005_v46 = vpop.f32.mrf.mxu2  ;;  %v2739_v52 = vpop.f32.mrf.mxu1 }
 0x1aa   : > { %v1021_v48 = vadd.f32 %v1005_v46, %v937_v18  ;;  %v938_v29 = vadd.f32 %v2739_v52, %v846_v60  ;;  %v1537_v60 = vld [vmem:[%s2904_s8] sm:$0xf] }
 0x1ac   : > { %v1094_v13 = vpop.f32.mrf.mxu3 }
 0x1ad   : > { %v1112_v42 = vadd.f32 %v1094_v13, %v1020_v41 }
 0x1af   : > { %v1204_v38 = vadd.f32 %v1186_v35, %v1112_v42  ;;  %v1511_v42 = vld [vmem:[%s2903_s7 + $0x30] sm:$0xff] }
 0x1b1   : > { %v2741_v61 = vpop.f32.mrf.mxu2  ;;  %v2743_v62 = vpop.f32.mrf.mxu1 }
 0x1b2   : > { %v1022_v46 = vadd.f32 %v2741_v61, %v938_v29  ;;  %v939_v52 = vadd.f32 %v2743_v62, %v847_v40 }
 0x1b4   : > { %v1097_v37 = vpop.f32.mrf.mxu3 }
 0x1b9   : > { %v2745_v54 = vpop.f32.mrf.mxu2  ;;  %v2747_v5 = vpop.f32.mrf.mxu1 }
 0x1ba   : > { %v1023_v61 = vadd.f32 %v2745_v54, %v939_v52 }
 0x1bc   : > { %v1100_v4 = vpop.f32.mrf.mxu3 }
 0x1c1   : > { %v2749_v58 = vpop.f32.mrf.mxu2  ;;  %v1261_v63 = vpop.f32.mrf.mxu1 }
 0x1c2   : > { %v1285_v57 = vadd.f32 %v1261_v63, %v1201_v21  ;;  %v1113_v63 = vadd.f32 %v1097_v37, %v1021_v48 }
 0x1c4   : > { %v1205_v21 = vadd.f32 %v1189_v50, %v1113_v63  ;;  %v1103_v36 = vpop.f32.mrf.mxu3  ;;  %v1506_v63 = vld [vmem:[%s2903_s7 + $0x8] sm:$0xff] }
 0x1c9   : > { %v1353_v6 = vpop.f32.mrf.mxu2  ;;  %v1264_v45 = vpop.f32.mrf.mxu1 }
 0x1ca   : > { %v1377_v20 = vadd.f32 %v1353_v6, %v1285_v57  ;;  %v1286_v15 = vadd.f32 %v1264_v45, %v1202_v12  ;;  %v1114_v6 = vadd.f32 %v1100_v4, %v1022_v46  ;;  %v1192_v45 = vpop.f32.mrf.mxu0  ;;  %v1115_v12 = vadd.f32 %v1103_v36, %v1023_v61 }
 0x1cc   : > { %v1389_v55 = vadd.f32 %v2755_v11, %v1377_v20  ;;  %v1206_v7 = vadd.f32 %v1192_v45, %v1114_v6 }
 0x1ce   : > { %v1397_v32 = vmax.f32 %v1389_v55, 0.0 }
 0x1d0   : > { %1824 = vmatmul.msk.f32.vlgmr.msra.gmra.mxu3 %vm464_vm1, %v1397_v32 }
 0x1d1   : > { %v1356_v17 = vpop.f32.mrf.mxu2  ;;  %v1267_v30 = vpop.f32.mrf.mxu1 }
 0x1d2   : > { %v1378_v28 = vadd.f32 %v1356_v17, %v1286_v15  ;;  %v1287_v47 = vadd.f32 %v1267_v30, %v1203_v33  ;;  %v848_v15 = vadd.f32 %v2737_v51, %v2729_v22  ;;  %v1195_v44 = vpop.f32.mrf.mxu0 }
 0x1d3   : > { %v1207_v23 = vadd.f32 %v1195_v44, %v1115_v12 }
 0x1d4   : > { %v1390_v9 = vadd.f32 %v2755_v11, %v1378_v28  ;;  %v940_v17 = vadd.f32 %v2747_v5, %v848_v15  ;;  %v1106_v28 = vpop.f32.mrf.mxu3 }
 0x1d6   : > { %v1398_v31 = vmax.f32 %v1390_v9, 0.0  ;;  %v1024_v54 = vadd.f32 %v2749_v58, %v940_v17 }
 0x1d8   : > { %1825 = vmatmul.msk.f32.gmra.mxu3 %vm464_vm1, %v1398_v31  ;;  %v1116_v9 = vadd.f32 %v1106_v28, %v1024_v54 }
 0x1d9   : > { %v1359_v53 = vpop.f32.mrf.mxu2  ;;  %v1270_v10 = vpop.f32.mrf.mxu1 }
 0x1da   : > { %v1379_v56 = vadd.f32 %v1359_v53, %v1287_v47  ;;  %v1288_v39 = vadd.f32 %v1270_v10, %v1204_v38  ;;  %v1198_v33 = vpop.f32.mrf.mxu0  ;;  %v1512_v53 = vld [vmem:[%s2903_s7 + $0x38] sm:$0xff] }
 0x1db   : > { %v1208_v35 = vadd.f32 %v1198_v33, %v1116_v9  ;;  %1524 = vmatpush.msrb.mxu0 %v1512_v53 }
 0x1dc   : > { %v1391_v16 = vadd.f32 %v2755_v11, %v1379_v56  ;;  %v1510_v56 = vld [vmem:[%s2903_s7 + $0x28] sm:$0xff] }
 0x1dd   : > { %1525 = vmatpush.msrb.mxu0 %v1511_v42 }
 0x1de   : > { %v1399_v19 = vmax.f32 %v1391_v16, 0.0  ;;  %v1508_v16 = vld [vmem:[%s2903_s7 + $0x18] sm:$0xff] }
 0x1df   : > { %1526 = vmatpush.msrb.mxu0 %v1510_v56 }
 0x1e0   : > { %1826 = vmatmul.msk.f32.gmra.mxu3 %vm464_vm1, %v1399_v19  ;;  %v1507_v19 = vld [vmem:[%s2903_s7 + $0x10] sm:$0xff] }
 0x1e1   : > { %v1362_v59 = vpop.f32.mrf.mxu2  ;;  %v1273_v2 = vpop.f32.mrf.mxu1 }
 0x1e2   : > { %v1380_v1 = vadd.f32 %v1362_v59, %v1288_v39  ;;  %v1289_v43 = vadd.f32 %v1273_v2, %v1205_v21  ;;  %v1914_v39 = vld [vmem:[%s2902_s6] ss:$0 sm:$0xff] }
 0x1e4   : > { %v1392_v27 = vadd.f32 %v2755_v11, %v1380_v1  ;;  %v1505_v1 = vld [vmem:[%s2903_s7] sm:$0xff] }
 0x1e6   : > { %v1400_v25 = vmax.f32 %v1392_v27, 0.0 }
 0x1e8   : > { %1827 = vmatmul.msk.f32.gmra.mxu3 %vm464_vm1, %v1400_v25  ;;  %v2065_v25 = vmov 64.0  }
 0x1e9   : > { %v1365_v57 = vpop.f32.mrf.mxu2  ;;  %v1276_v20 = vpop.f32.mrf.mxu1  ;;  %1915 = vrcp.f32 %v2065_v25 }
 0x1ea   : > { %v1381_v24 = vadd.f32 %v1365_v57, %v1289_v43  ;;  %v1290_v8 = vadd.f32 %v1276_v20, %v1206_v7 }
 0x1ec   : > { %v1393_v49 = vadd.f32 %v2755_v11, %v1381_v24 }
 0x1ee   : > { %v1401_v55 = vmax.f32 %v1393_v49, 0.0 }
 0x1ef   : > { %v1916_v36 = vpop.eup %1915 }
 0x1f0   : > { %1828 = vmatmul.msk.f32.gmra.mxu3 %vm464_vm1, %v1401_v55  ;;  %vm1502_vm10 = vweird.f32 %v1916_v36 }
 0x1f1   : > { %v1368_v32 = vpop.f32.mrf.mxu2  ;;  %v1279_v0 = vpop.f32.mrf.mxu1 }
 0x1f2   : > { %v1382_v13 = vadd.f32 %v1368_v32, %v1290_v8  ;;  %v1291_v30 = vadd.f32 %v1279_v0, %v1207_v23  ;;  %v1498_v8 = vmul.f32 64.0, %v1916_v36 }
 0x1f4   : > { %v1394_v14 = vadd.f32 %v2755_v11, %v1382_v13 }
 0x1f6   : > { %v1402_v62 = vmax.f32 %v1394_v14, 0.0  ;;  %v1499_v14 = vsub.f32 1.0, %v1498_v8 }
 0x1f8   : > { %1829 = vmatmul.msk.f32.gmra.mxu3 %vm464_vm1, %v1402_v62  ;;  %v1500_v62 = vmul.f32 %v1916_v36, %v1499_v14 }
 0x1f9   : > { %v1371_v34 = vpop.f32.mrf.mxu2  ;;  %v1282_v22 = vpop.f32.mrf.mxu1 }
 0x1fa   : > { %v1383_v3 = vadd.f32 %v1371_v34, %v1291_v30  ;;  %v1292_v41 = vadd.f32 %v1282_v22, %v1208_v35  ;;  %v1501_v54 = vadd.f32 %v1916_v36, %v1500_v62 }
 0x1fc   : > { %v1395_v31 = vadd.f32 %v2755_v11, %v1383_v3  ;;  %v1503_v9 = vsel %vm1502_vm10, %v1916_v36, %v1501_v54 }
 0x1fe   : > { %v1403_v51 = vmax.f32 %v1395_v31, 0.0 }
 0x200   : > { %1830 = vmatmul.msk.f32.gmra.mxu3 %vm464_vm1, %v1403_v51 }
 0x201   : > { %v1374_v5 = vpop.f32.mrf.mxu2 }
 0x202   : > { %v1384_v47 = vadd.f32 %v1374_v5, %v1292_v41 }
 0x204   : > { %v1396_v37 = vadd.f32 %v2755_v11, %v1384_v47  ;;  %v1509_v11 = vld [vmem:[%s2903_s7 + $0x20] sm:$0xff] }
 0x205   : > { %1527 = vmatpush.msrb.mxu0 %v1509_v11 }
 0x206   : > { %v1404_v58 = vmax.f32 %v1396_v37, 0.0 }
 0x207   : > { %1528 = vmatpush.msrb.mxu0 %v1508_v16 }
 0x208   : > { %1831 = vmatmul.msk.f32.gmra.mxu3 %vm464_vm1, %v1404_v58  ;;  %vm2956_vm1 = vcmask 523264  }
 0x209   : > { %1529 = vmatpush.msrb.mxu0 %v1507_v19  ;;  %vm2957_vm3 = vmmov %vm2956_vm1 }
 0x20a   : > { %vm2958_vm4 = vmmov %vm2956_vm1 }
 0x20b   : > { %1530 = vmatpush.msrb.mxu0 %v1506_v63  ;;  %vm2959_vm5 = vmmov %vm2956_vm1 }
 0x20c   : > { %vm2960_vm6 = vmmov %vm2956_vm1 }
 0x20d   : > { %1531 = vmatpush.msrb.mxu0 %v1505_v1  ;;  %vm2961_vm7 = vmmov %vm2956_vm1 }
 0x20e   : > { %vm2962_vm8 = vmmov %vm2956_vm1 }
 0x20f   : > { %1833 = vmatpush.msk.msra.mxu0 %vm1542_vm0, %v1537_v60  ;;  %vm2963_vm9 = vmmov %vm2956_vm1 }
 0x210   : > { %vm2964_vm11 = vmmov %vm2956_vm1 }
 0x211   : > { %vm2965_vm0 = vmmov %vm2956_vm1 }
 0x253   : > { %v1452_v10 = vpop.f32.mrf.mxu3 }
 0x254   : > { %v2819_v2 = vadd.f32 %v1914_v39, %v1452_v10 }
 0x256   : > { %v1476_v21 = vsel %vm2957_vm3, %v2819_v2, 0.0  ;;  %vm2967_vm3 = vmmov %vm2965_vm0 }
 0x25b   : > { %v1455_v26 = vpop.f32.mrf.mxu3 }
 0x25c   : > { %v2811_v59 = vadd.f32 %v1914_v39, %v1455_v26 }
 0x25e   : > { %v1477_v27 = vsel %vm2956_vm1, %v2811_v59, 0.0  ;;  %vm2966_vm1 = vmmov %vm2965_vm0 }
 0x25f   : > { %v1478_v57 = vadd.f32 %v1477_v27, %v1476_v21  ;;  %v1921_v27 = vld [vmem:[%s2223_s17] sm:$0xff]  ;;  %v1922_v21 = vld [vmem:[%s2223_s17 + $0x8] sm:$0xff] }
 0x263   : > { %v1458_v18 = vpop.f32.mrf.mxu3 }
 0x264   : > { %v2821_v4 = vadd.f32 %v1914_v39, %v1458_v18 }
 0x266   : > { %v1479_v46 = vsel %vm2958_vm4, %v2821_v4, 0.0  ;;  %vm2968_vm4 = vmmov %vm2965_vm0 }
 0x267   : > { %v1480_v45 = vadd.f32 %v1479_v46, %v1478_v57 }
 0x26b   : > { %v1461_v38 = vpop.f32.mrf.mxu3 }
 0x26c   : > { %v2828_v29 = vadd.f32 %v1914_v39, %v1461_v38 }
 0x26e   : > { %v1481_v24 = vsel %vm2959_vm5, %v2828_v29, 0.0  ;;  %vm2969_vm5 = vmmov %vm2965_vm0 }
 0x26f   : > { %v1482_v52 = vadd.f32 %v1481_v24, %v1480_v45 }
 0x273   : > { %v1464_v48 = vpop.f32.mrf.mxu3 }
 0x274   : > { %v1465_v43 = vadd.f32 %v1914_v39, %v1464_v48 }
 0x276   : > { %v1483_v40 = vsel %vm2960_vm6, %v1465_v43, 0.0  ;;  %vm2970_vm6 = vmmov %vm2965_vm0 }
 0x277   : > { %v1484_v7 = vadd.f32 %v1483_v40, %v1482_v52  ;;  %v1928_v52 = vld [vmem:[%s2223_s17 + $0x38] sm:$0xff] }
 0x27b   : > { %v1467_v50 = vpop.f32.mrf.mxu3 }
 0x27c   : > { %v1468_v20 = vadd.f32 %v1914_v39, %v1467_v50 }
 0x27e   : > { %v1485_v55 = vsel %vm2961_vm7, %v1468_v20, 0.0  ;;  %vm2971_vm7 = vmmov %vm2965_vm0 }
 0x27f   : > { %v1486_v32 = vadd.f32 %v1485_v55, %v1484_v7 }
 0x283   : > { %v1470_v6 = vpop.f32.mrf.mxu3 }
 0x284   : > { %v1471_v49 = vadd.f32 %v1914_v39, %v1470_v6 }
 0x286   : > { %v1487_v61 = vsel %vm2962_vm8, %v1471_v49, 0.0  ;;  %vm2972_vm8 = vmmov %vm2965_vm0 }
 0x287   : > { %v1488_v0 = vadd.f32 %v1487_v61, %v1486_v32 }
 0x28b   : > { %v1473_v12 = vpop.f32.mrf.mxu3 }
 0x28c   : > { %v1474_v13 = vadd.f32 %v1914_v39, %v1473_v12 }
 0x28e   : > { %v1489_v15 = vsel %vm2963_vm9, %v1474_v13, 0.0 }
 0x28f   : > { %v1490_v44 = vadd.f32 %v1489_v15, %v1488_v0 }
 0x291   : > { %v1491_v17 = vrot.slane %v1490_v44, 4 }
 0x293   : > { %v1492_v23 = vadd.f32 %v1491_v17, %v1490_v44 }
 0x295   : > { %v1493_v28 = vrot.slane %v1492_v23, 2 }
 0x297   : > { %v1494_v30 = vadd.f32 %v1493_v28, %v1492_v23 }
 0x299   : > { %v1495_v34 = vrot.slane %v1494_v30, 1 }
 0x29b   : > { %v1496_v3 = vadd.f32 %v1495_v34, %v1494_v30 }
 0x29d   : > { %v1504_v31 = vmul.f32 %v1503_v9, %v1496_v3 }
 0x29f   : > { %1832 = vmatmul.msk.f32.vlgmr.msrb.gmra.mxu0 %vm2964_vm11, %v1504_v31 }
 0x31c   : > { %v1533_v33 = vpop.f32.mrf.mxu0 }
 0x31d   : > { %v1536_v22 = vmax.f32 %v1533_v33, 0.0 }
 0x31f   : > { %1834 = vmatmul.msk.f32.vlgmr.msra.gmra.mxu0 %vm1538_vm12, %v1536_v22 }
 0x39c   : > { %v1563_v51 = vpop.f32.mrf.mxu0 }
 0x39d   : > { %v1835_v35 = vmul.f32 -1.442695, %v1563_v51 }
 0x39f   : > { %1917 = vpow2.f32 %v1835_v35 }
 0x3a5   : > { %v1918_v41 = vpop.eup %1917 }
 0x3a6   : > { %v1569_v5 = vadd.f32 1.0, %v1918_v41 }
 0x3a8   : > { %1919 = vrcp.f32 %v1569_v5  ;;  %v1581_v53 = vand.u32 2147483648, %v1569_v5  ;;  %v1579_v56 = vand.u32 2147483647, %v1569_v5  ;;  %vm1575_vm14 = vweird.f32 %v1569_v5 }
 0x3aa   : > { %v1582_v11 = vor.u32 1.1754944e-38, %v1581_v53  ;;  %vm1580_vm2 = vcmp.eq.f32.partialorder %v1579_v56, 8.507059e+37 }
 0x3ae   : > { %v1920_v47 = vpop.eup %1919 }
 0x3af   : > { %v1571_v37 = vmul.f32 %v1920_v47, %v1569_v5  ;;  %vm1576_vm13 = vweird.f32 %v1920_v47 }
 0x3b0   : > { %vm1577_vm15 = vmor %vm1575_vm14, %vm1576_vm13 }
 0x3b1   : > { %v1572_v58 = vsub.f32 1.0, %v1571_v37 }
 0x3b3   : > { %v1573_v42 = vmul.f32 %v1920_v47, %v1572_v58 }
 0x3b5   : > { %v1574_v10 = vadd.f32 %v1920_v47, %v1573_v42 }
 0x3b7   : > { %v1578_v26 = vsel %vm1577_vm15, %v1920_v47, %v1574_v10 }
 0x3b8   : > { %v1583_v16 = vsel %vm1580_vm2, %v1582_v11, %v1578_v26 }
 0x3b9   : > { %v1585_v18 = vperm.slane %v1583_v16, 0 }
 0x3bb   : > { %v1586_v19 = vmul.f32 %v1585_v18, %v2819_v2  ;;  %v1587_v38 = vmul.f32 %v1585_v18, %v2811_v59  ;;  %v1588_v48 = vmul.f32 %v1585_v18, %v2821_v4  ;;  %v1589_v39 = vmul.f32 %v1585_v18, %v2828_v29  ;;  %v1923_v2 = vld [vmem:[%s2223_s17 + $0x10] sm:$0xff]  ;;  %v1924_v59 = vld [vmem:[%s2223_s17 + $0x18] sm:$0xff]  ;;  %v1925_v4 = vld [vmem:[%s2223_s17 + $0x20] sm:$0xff] }
 0x3bc   : > { %v1590_v50 = vmul.f32 %v1585_v18, %v1465_v43  ;;  %v1591_v63 = vmul.f32 %v1585_v18, %v1468_v20  ;;  %v1592_v1 = vmul.f32 %v1585_v18, %v1471_v49  ;;  %v1593_v60 = vmul.f32 %v1585_v18, %v1474_v13  ;;  %v1926_v29 = vld [vmem:[%s2223_s17 + $0x28] sm:$0xff]  ;;  %v1927_v43 = vld [vmem:[%s2223_s17 + $0x30] sm:$0xff]  ;;  %s2003_s17 = sshra.s32 %s1634_s14, 4  ;;  %s2004_s17 = int_to_ptr.hbm [resolvable:$true] %s2003_s17 }
 0x3bd   : > { %v1594_v25 = vadd.f32 %v1921_v27, %v1586_v19  ;;  %v1595_v46 = vadd.f32 %v1922_v21, %v1587_v38  ;;  %v1596_v57 = vadd.f32 %v1923_v2, %v1588_v48  ;;  %v1597_v6 = vadd.f32 %v1924_v59, %v1589_v39  ;;  %s2005_s26 = scalar_lea.hbm %s2004_s17, 64  ;;  %p2010_p11 = scmp.lt.s32.totalorder %s2004_s17, %s2905_s9 }
 0x3be   : > { %v1598_v24 = vadd.f32 %v1925_v4, %v1590_v50  ;;  %v1599_v45 = vadd.f32 %v1926_v29, %v1591_v63  ;;  %v1600_v20 = vadd.f32 %v1927_v43, %v1592_v1  ;;  %v1601_v55 = vadd.f32 %v1928_v52, %v1593_v60  ;;  %p2006_p1 = scmp.ne.s32.totalorder %s2004_s17, %s2005_s26  ;;  %p2011_p9 = scmp.lt.s32.totalorder %s2009_s24, %s2005_s26 }
 0x3bf   : > { %v1602_v40 = vmax.f32 %v1594_v25, 0.0  ;;  %v1603_v49 = vmax.f32 %v1595_v46, 0.0  ;;  %v1604_v36 = vmax.f32 %v1596_v57, 0.0  ;;  %v1605_v7 = vmax.f32 %v1597_v6, 0.0 }
 0x3c0   : > { %v1606_v61 = vmax.f32 %v1598_v24, 0.0  ;;  %v1607_v8 = vmax.f32 %v1599_v45, 0.0  ;;  %v1608_v32 = vmax.f32 %v1600_v20, 0.0  ;;  %v1609_v12 = vmax.f32 %v1601_v55, 0.0  ;;  %p2007_p4 = pnand %p2006_p1, %p2187_p3  ;;  %p2012_p2 = por %p2011_p9, %p2010_p11 }
 0x3c1   : > { %1610 = vst.msk [vmem:[%s369_s21] sm:$0xff] %vm2965_vm0, %v1602_v40 }
 0x3c2   : > { %1611 = vst.msk [vmem:[%s369_s21 + $0x8] sm:$0xff] %vm2966_vm1, %v1603_v49  ;;  %p2008_p8 = pneg %p2007_p4 }
 0x3c3   : > { %1612 = vst.msk [vmem:[%s369_s21 + $0x10] sm:$0xff] %vm2967_vm3, %v1604_v36 }
 0x3c4   : > { %1613 = vst.msk [vmem:[%s369_s21 + $0x18] sm:$0xff] %vm2968_vm4, %v1605_v7  ;;  %p2013_p10 = pnand %p2012_p2, %p2008_p8 }
 0x3c5   : > { %1614 = vst.msk [vmem:[%s369_s21 + $0x20] sm:$0xff] %vm2969_vm5, %v1606_v61 }
 0x3c6   : > { %1615 = vst.msk [vmem:[%s369_s21 + $0x28] sm:$0xff] %vm2970_vm6, %v1607_v8 }
 0x3c7   : > { %1616 = vst.msk [vmem:[%s369_s21 + $0x30] sm:$0xff] %vm2971_vm7, %v1608_v32 }
 0x3c8   : > { %1617 = vst.msk [vmem:[%s369_s21 + $0x38] sm:$0xff] %vm2972_vm8, %v1609_v12 }
 0x3c9   : > { %2016 = shalt.err (!%p2013_p10)
}
 0x3ca   : > { %s2066_s5 = smov 128   ;;  %s2067_s27 = smov 8  }
 0x3cb   : > { %1855 = dma.vmem_to_hbm [thread:$0]  (%p2187_p3), %s1632_s19, 1024, %s1634_s14, %s1619_s11, %s2066_s5, %s2066_s5, %s2067_s27  }
 0x3cc PF: > { %s1648_s13 = sand.u32 1, %s2047_s30   ;;  %p2973_p12 = scmp.ge.s32.totalorder %s2059_s12, 2 }
 0x3cd   : > { %s1649_s18 = scalar_lea.sflag [#allocation5], %s1648_s13 }
 0x3ce   : > { %p1866_p13 = pnand %p2973_p12, %p2153_p6 }
 0x3d0   : > { %p1867_p0 = pneg %p1866_p13 }
 0x3d2   : > { %2042 = dma.done.wait (%p1867_p0), %s1649_s18, 1024  }
 0x3d3   : > { %2044 = vsyncadd (%p1867_p0), %s1649_s18, 4294966272  ;;  %s2974_s15 = sld [smem:[#allocation12_spill]]  ;;  %p23_p5 = scmp.ge.s32.totalorder %s2171_s23, 4  }
 0x3d4   : > { %s2975_s11 = sld [smem:[#allocation13_spill]]  ;;  %s2976_s30 = smov %s2051_s10 }
 0x3d5   : > { %s2978_s12 = smov %s2171_s23  ;;  %25 = sbr.rel (!%p23_p5) target bundleno = 8 (0x8), region = 113 }
 0x3d9   : > { %s2977_s10 = smov %s2974_s15 }
 0x3da   :  { %1655 = vsyncpa [#allocation4], 1 }
 0x3db   :  { %1657 = vsyncpa [#allocation4 + $0x1], 1 }
 0x3dc   :  { %1658 = vsyncpa [#allocation7], 1 }
 0x3dd   :  { %1659 = vsyncpa [#allocation5], 1 }
 0x3de   :  { %1661 = vsyncpa [#allocation5 + $0x1], 1 }

</bundles_post_ra>
